<compile_context>
chip_gen: v7x
topology: tpu7x:2x2x1
jax: 0.10.0
libtpu: 0.0.40
codegen_flags: <defaults>
</compile_context>

<pallas_src>
import functools
import numpy as np
import jax
import jax.numpy as jnp
from jax.experimental import pallas as pl
from jax.experimental.pallas import tpu as pltpu

_VMEM_LIMIT = 64 * 1024 * 1024


def _round_up(x, m):
    return ((x + m - 1) // m) * m


def _pick_tile(total, target):
    """Largest divisor of `total` that is <= target and a multiple of 8 (falls back to total)."""
    if total <= target:
        return total
    for t in range(target, 7, -1):
        if total % t == 0 and t % 8 == 0:
            return t
    return total


# ----------------------------- GEMM (bias + optional ReLU) -----------------------------

def _gemm_bias_kernel(a_ref, b_ref, bias_ref, o_ref, *, relu):
    acc = jnp.dot(a_ref[...], b_ref[...], preferred_element_type=jnp.float32)
    acc = acc + bias_ref[...]
    if relu:
        acc = jnp.maximum(acc, 0.0)
    o_ref[...] = acc.astype(o_ref.dtype)


def gemm_bias(a, b, bias, relu=False, tm=512, out_dtype=jnp.float32):
    """out = act(a @ b + bias); a:(M,K), b:(K,N). bf16 MXU, f32 accum/epilogue."""
    M, K = a.shape
    N = b.shape[1]
    tm = min(tm, _round_up(M, 8))
    Mp = _round_up(M, tm)
    a_p = a if a.dtype == jnp.bfloat16 else a.astype(jnp.bfloat16)
    if Mp != M:
        a_p = jnp.pad(a_p, ((0, Mp - M), (0, 0)))
    out = pl.pallas_call(
        functools.partial(_gemm_bias_kernel, relu=relu),
        out_shape=jax.ShapeDtypeStruct((Mp, N), out_dtype),
        grid=(Mp // tm,),
        in_specs=[pl.BlockSpec((tm, K), lambda i: (i, 0)),
                  pl.BlockSpec((K, N), lambda i: (0, 0)),
                  pl.BlockSpec((1, N), lambda i: (0, 0))],
        out_specs=pl.BlockSpec((tm, N), lambda i: (i, 0)),
        compiler_params=pltpu.CompilerParams(
            dimension_semantics=("parallel",), vmem_limit_bytes=_VMEM_LIMIT),
    )(a_p, b.astype(jnp.bfloat16), bias.reshape(1, N).astype(jnp.float32))
    return out if Mp == M else out[:M]


# ----------------------------- 3x3 conv (in-kernel halo, merged-K taps) -----------------------------

def _conv3x3_kernel(x_ref, w_ref, b_ref, o_ref, *, stride, relu, Ho, Wo, wpack):
    Cout = b_ref.shape[-1]
    Cin = w_ref.shape[0] // 9
    x = x_ref[...]                                  # bf16 end-to-end; no f32 round trip
    b = b_ref[...]

    def accumulate(tap_fn, rows):
        acc = jnp.zeros((rows, Cout), jnp.float32)
        for di in range(3):
            # merge the 3 width taps into one K=3*Cin MXU push (fewer, deeper dots)
            xs = jnp.concatenate([tap_fn(di, dj) for dj in range(3)], axis=-1)
            acc = acc + jnp.dot(xs.reshape(rows, 3 * Cin),
                                w_ref[di * 3 * Cin:(di + 1) * 3 * Cin, :],
                                preferred_element_type=jnp.float32)
        acc = acc + b
        return jnp.maximum(acc, 0.0) if relu else acc

    if wpack:
        # stride-1, Cout<=64, even W: width parity lives in lanes of both input view and output,
        # so the store is a full 2*Cout (=128) lane-dense block.  Only leading-dim reshapes used.
        Wo2 = Wo // 2

        def tap(p):
            def f(di, dj):
                cq, lp = (p + dj) // 2, (p + dj) % 2
                return x[di:di + Ho, cq:cq + Wo2, lp * Cin:(lp + 1) * Cin]
            return f

        out = jnp.concatenate([accumulate(tap(0), Ho * Wo2),
                               accumulate(tap(1), Ho * Wo2)], axis=-1)
    elif stride == 1:
        def f(di, dj):
            return x[di:di + Ho, dj:dj + Wo, :]
        out = accumulate(f, Ho * Wo)
    else:
        # phase-decomposed input (2, 2, Hq, Wq, Cin): only contiguous slices needed
        def f(di, dj):
            return x[di % 2, dj % 2, di // 2:di // 2 + Ho, dj // 2:dj // 2 + Wo, :]
        out = accumulate(f, Ho * Wo)
    o_ref[...] = out.astype(o_ref.dtype)


def conv3x3(x_nhwc, w_oihw, bias, stride=1, relu=True, out_dtype=jnp.bfloat16):
    """3x3 conv, padding=1, stride in {1,2}. Weights are PyTorch (Cout, Cin, 3, 3)."""
    N, H, W, Cin = x_nhwc.shape
    Cout = w_oihw.shape[0]
    Ho = (H - 1) // stride + 1
    Wo = (W - 1) // stride + 1
    Hp, Wp = H + 2, W + 2
    xp = jnp.pad(x_nhwc.astype(jnp.bfloat16), ((0, 0), (1, 1), (1, 1), (0, 0)))
    wpack = (stride == 1 and Cout <= 64 and Wo % 2 == 0 and Wp % 2 == 0)
    if wpack:
        x_in = xp.reshape(N, Hp, Wp // 2, 2 * Cin)          # free view: width parity -> lanes
        x_block = (None, Hp, Wp // 2, 2 * Cin)
        x_index = lambda n: (n, 0, 0, 0)
        out_rows, out_cols = Ho * (Wo // 2), 2 * Cout
    elif stride == 1:
        x_in, x_block = xp, (None, Hp, Wp, Cin)
        x_index = lambda n: (n, 0, 0, 0)
        out_rows, out_cols = Ho * Wo, Cout
    else:
        assert Hp % 2 == 0 and Wp % 2 == 0
        x_in = jnp.transpose(xp.reshape(N, Hp // 2, 2, Wp // 2, 2, Cin),
                             (0, 2, 4, 1, 3, 5))             # (N, 2, 2, Hp/2, Wp/2, Cin)
        x_block = (None, 2, 2, Hp // 2, Wp // 2, Cin)
        x_index = lambda n: (n, 0, 0, 0, 0, 0)
        out_rows, out_cols = Ho * Wo, Cout
    w_mat = jnp.transpose(w_oihw, (2, 3, 1, 0)).reshape(9 * Cin, Cout).astype(jnp.bfloat16)
    out = pl.pallas_call(
        functools.partial(_conv3x3_kernel, stride=stride, relu=relu, Ho=Ho, Wo=Wo, wpack=wpack),
        out_shape=jax.ShapeDtypeStruct((N, out_rows, out_cols), out_dtype),
        grid=(N,),
        in_specs=[pl.BlockSpec(x_block, x_index),
                  pl.BlockSpec((9 * Cin, Cout), lambda n: (0, 0)),
                  pl.BlockSpec((1, Cout), lambda n: (0, 0))],
        out_specs=pl.BlockSpec((None, out_rows, out_cols), lambda n: (n, 0, 0)),
        compiler_params=pltpu.CompilerParams(
            dimension_semantics=("parallel",), vmem_limit_bytes=_VMEM_LIMIT),
    )(x_in, w_mat, bias.reshape(1, Cout).astype(jnp.float32))
    return out.reshape(N, Ho, Wo, Cout)                      # free view back to NHWC


# ----------------------------- Fused upsample (1x1 conv + deconv2x + concat) -----------------------------

def _upsample_concat_kernel(x0_ref, x1_ref, w0_ref, b0_ref, w1_ref, b1_ref, o_ref):
    Hh, _, Wh, CC = x0_ref.shape            # (Hh, 1, Wh, 2*C0) : lanes = (w-parity, C0)
    C0 = CC // 2
    Cout = w0_ref.shape[1]
    C1 = x1_ref.shape[-1]
    x1 = x1_ref[...]
    up1 = jnp.dot(x1.reshape(Hh * Wh, C1), w1_ref[...],
                  preferred_element_type=jnp.float32) + b1_ref[...]
    up1 = jnp.maximum(up1, 0.0)             # (Hh*Wh, 2*Cout), columns ordered (kw, Cout)

    def conv0(xs):
        r = jnp.dot(xs.reshape(Hh * Wh, C0), w0_ref[...],
                    preferred_element_type=jnp.float32) + b0_ref[...]
        return jnp.maximum(r, 0.0)

    up0_even = conv0(x0_ref[:, 0, :, 0:C0])        # even output columns
    up0_odd = conv0(x0_ref[:, 0, :, C0:2 * C0])    # odd output columns
    dt = o_ref.dtype
    o_ref[:, 0, :, 0 * Cout:1 * Cout] = up0_even.reshape(Hh, Wh, Cout).astype(dt)
    o_ref[:, 0, :, 1 * Cout:2 * Cout] = up1[:, 0:Cout].reshape(Hh, Wh, Cout).astype(dt)
    o_ref[:, 0, :, 2 * Cout:3 * Cout] = up0_odd.reshape(Hh, Wh, Cout).astype(dt)
    o_ref[:, 0, :, 3 * Cout:4 * Cout] = up1[:, Cout:2 * Cout].reshape(Hh, Wh, Cout).astype(dt)


def upsample_concat(x0, x1, w0_oihw, b0, w1_iohw, b1, out_dtype=jnp.bfloat16):
    """deblock0: Conv2d 1x1 on x0; deblock1: ConvTranspose2d(k=2,s=2) on x1; channel concat.
    The fused kernel writes the (N, H, W, 2*Cout) NHWC result directly (pixel shuffle and concat
    handled by free views / the output BlockSpec) -- no extra XLA HBM passes."""
    N, H, W, C0 = x0.shape
    _, Hh, Wh, C1 = x1.shape
    assert H == 2 * Hh and W == 2 * Wh
    Cout = w0_oihw.shape[0]
    x0v = x0.astype(jnp.bfloat16).reshape(N, Hh, 2, Wh, 2 * C0)   # free view: h/w parity exposed
    x1b = x1.astype(jnp.bfloat16)
    w0_mat = w0_oihw.reshape(Cout, C0).T.astype(jnp.bfloat16)     # (C0, Cout)
    # ConvTranspose weight (Cin, Cout, 2, 2) -> per output-row-parity kh, columns ordered (kw, Cout)
    w1_mat = jnp.transpose(w1_iohw, (2, 0, 3, 1)).reshape(2, C1, 2 * Cout).astype(jnp.bfloat16)
    b0v = b0.reshape(1, Cout).astype(jnp.float32)
    b1v = jnp.tile(b1.reshape(1, Cout), (1, 2)).astype(jnp.float32)
    out = pl.pallas_call(
        _upsample_concat_kernel,
        out_shape=jax.ShapeDtypeStruct((N, Hh, 2, Wh, 4 * Cout), out_dtype),
        grid=(N, 2),
        in_specs=[pl.BlockSpec((None, Hh, 1, Wh, 2 * C0), lambda n, kh: (n, 0, kh, 0, 0)),
                  pl.BlockSpec((None, Hh, Wh, C1), lambda n, kh: (n, 0, 0, 0)),
                  pl.BlockSpec((C0, Cout), lambda n, kh: (0, 0)),
                  pl.BlockSpec((1, Cout), lambda n, kh: (0, 0)),
                  pl.BlockSpec((None, C1, 2 * Cout), lambda n, kh: (kh, 0, 0)),
                  pl.BlockSpec((1, 2 * Cout), lambda n, kh: (0, 0))],
        out_specs=pl.BlockSpec((None, Hh, 1, Wh, 4 * Cout), lambda n, kh: (n, 0, kh, 0, 0)),
        compiler_params=pltpu.CompilerParams(
            dimension_semantics=("parallel", "parallel"), vmem_limit_bytes=_VMEM_LIMIT),
    )(x0v, x1b, w0_mat, b0v, w1_mat, b1v)
    # (N, Hh, 2, Wh, (kw, [up0|up1])) is exactly (N, H, W, 2*Cout) in memory -> free reshape
    return out.reshape(N, H, W, 2 * Cout)


# ----------------------------- PillarVFE -----------------------------

def _pillar_vfe_kernel(pts_ref, npts_ref, w_ref, b_ref, o_ref):
    TP, M, F = pts_ref.shape
    C = w_ref.shape[-1]
    point_idx = jax.lax.broadcasted_iota(jnp.int32, (TP, M, 1), 1)
    valid = (point_idx < npts_ref[...].reshape(TP, 1, 1)).astype(jnp.float32)
    pts = pts_ref[...] * valid                      # mask raw points (matches OpenCOOD PillarVFE)
    x = jnp.dot(pts.reshape(TP * M, F).astype(jnp.bfloat16), w_ref[...],
                preferred_element_type=jnp.float32)
    x = jnp.maximum(x + b_ref[...], 0.0)            # linear + BN(id) + ReLU
    o_ref[...] = jnp.max(x.reshape(TP, M, C), axis=1).astype(o_ref.dtype)


def pillar_vfe(points, num_points, w, b, tp_max=2048):
    P, M, F = points.shape
    C = w.shape[1]
    Pp = _round_up(P, 8)
    tp = Pp if Pp <= tp_max else tp_max             # large tile: avoid per-step grid overhead
    Pp = _round_up(Pp, tp)
    pts = jnp.pad(points, ((0, Pp - P), (0, 0), (0, 0))) if Pp != P else points
    npts = jnp.pad(num_points.astype(jnp.int32), (0, Pp - P)).reshape(Pp, 1)
    out = pl.pallas_call(
        _pillar_vfe_kernel,
        out_shape=jax.ShapeDtypeStruct((Pp, C), jnp.bfloat16),
        grid=(Pp // tp,),
        in_specs=[pl.BlockSpec((tp, M, F), lambda i: (i, 0, 0)),
                  pl.BlockSpec((tp, 1), lambda i: (i, 0)),
                  pl.BlockSpec((F, C), lambda i: (0, 0)),
                  pl.BlockSpec((1, C), lambda i: (0, 0))],
        out_specs=pl.BlockSpec((tp, C), lambda i: (i, 0)),
        compiler_params=pltpu.CompilerParams(
            dimension_semantics=("parallel",), vmem_limit_bytes=_VMEM_LIMIT),
    )(pts, npts, w.astype(jnp.bfloat16), b.reshape(1, C).astype(jnp.float32))
    return out[:P]


# ----------------------------- Fused cls+reg heads (+ confidence masks) -----------------------------

def _heads_mask_kernel(ego_ref, a_ref, w_ref, b_ref, o_ref, *, n_cls, raw_col, fused_col, threshold):
    acc = jnp.dot(a_ref[...], w_ref[...], preferred_element_type=jnp.float32) + b_ref[...]
    conf = jnp.max(jax.nn.sigmoid(acc[:, :n_cls]), axis=-1, keepdims=True)
    raw_mask = jnp.where(conf > threshold, 1.0, 0.0)            # pre-override mask (for comm rate)
    ego = ego_ref[pl.program_id(0)].astype(jnp.float32)         # per-agent ego flag from SMEM
    fused_mask = jnp.maximum(raw_mask, ego)                     # ego rows always kept
    col = jax.lax.broadcasted_iota(jnp.int32, acc.shape, 1)
    out = jnp.where(col == raw_col, raw_mask, acc)
    out = jnp.where(col == fused_col, fused_mask, out)
    o_ref[...] = out.astype(o_ref.dtype)


def heads_with_mask(feat, ego_flags, head_w_p, head_b_p, n_cls, threshold=0.01, thw_max=1024):
    """feat: (Nag, HW, C) bf16.  Output (Nag, HW, 128): cols [0:2]=cls, [2:16]=reg,
    [16]=raw comm mask, [17]=mask with ego override."""
    Nag, HW, C = feat.shape
    NH = head_w_p.shape[1]
    thw = _pick_tile(HW, thw_max)
    feat_b = feat if feat.dtype == jnp.bfloat16 else feat.astype(jnp.bfloat16)
    out = pl.pallas_call(
        functools.partial(_heads_mask_kernel, n_cls=n_cls, raw_col=16, fused_col=17,
                          threshold=threshold),
        out_shape=jax.ShapeDtypeStruct((Nag, HW, NH), jnp.float32),
        grid_spec=pltpu.PrefetchScalarGridSpec(
            num_scalar_prefetch=1,
            grid=(Nag, HW // thw),
            in_specs=[pl.BlockSpec((None, thw, C), lambda n, t, ego: (n, t, 0)),
                      pl.BlockSpec((C, NH), lambda n, t, ego: (0, 0)),
                      pl.BlockSpec((1, NH), lambda n, t, ego: (0, 0))],
            out_specs=pl.BlockSpec((None, thw, NH), lambda n, t, ego: (n, t, 0))),
        compiler_params=pltpu.CompilerParams(
            dimension_semantics=("parallel", "parallel"), vmem_limit_bytes=_VMEM_LIMIT),
    )(ego_flags, feat_b, head_w_p.astype(jnp.bfloat16),
      head_b_p.reshape(1, NH).astype(jnp.float32))
    return out


# ----------------------------- Where2comm AttFusion -----------------------------

def _att_fusion_kernel(rl_ref, feat_ref, mask_ref, o_ref):
    # feat_ref: (Lmax, thw, C) bf16, mask_ref: (Lmax, thw, 1) f32.  Ego = agent 0 of each sample.
    b = pl.program_id(0)
    n_valid = rl_ref[b]
    Lmax, _, C = feat_ref.shape
    scale = 1.0 / float(C) ** 0.5
    xs = [feat_ref[l].astype(jnp.float32) * mask_ref[l] for l in range(Lmax)]   # comm mask fused
    q = xs[0]
    scores = []
    for l in range(Lmax):
        s = jnp.sum(q * xs[l], axis=-1, keepdims=True) * scale        # (thw, 1), C stays in lanes
        scores.append(jnp.where(l < n_valid, s, -1e30))                # drop padded agents
    m = scores[0]
    for l in range(1, Lmax):
        m = jnp.maximum(m, scores[l])
    es = [jnp.exp(s - m) for s in scores]
    denom = es[0]
    for l in range(1, Lmax):
        denom = denom + es[l]
    inv = pl.reciprocal(denom, approx=True)
    out = (es[0] * inv) * xs[0]
    for l in range(1, Lmax):
        out = out + (es[l] * inv) * xs[l]
    o_ref[...] = out.astype(o_ref.dtype)


def att_fusion(feat_pad, mask_pad, record_len_dev, thw_max=1024):
    B, Lmax, HW, C = feat_pad.shape
    thw = _pick_tile(HW, thw_max)
    out = pl.pallas_call(
        _att_fusion_kernel,
        out_shape=jax.ShapeDtypeStruct((B, HW, C), jnp.bfloat16),
        grid_spec=pltpu.PrefetchScalarGridSpec(
            num_scalar_prefetch=1,
            grid=(B, HW // thw),
            in_specs=[pl.BlockSpec((None, Lmax, thw, C), lambda b, h, rl: (b, 0, h, 0)),
                      pl.BlockSpec((None, Lmax, thw, 1), lambda b, h, rl: (b, 0, h, 0))],
            out_specs=pl.BlockSpec((None, thw, C), lambda b, h, rl: (b, h, 0))),
        compiler_params=pltpu.CompilerParams(
            dimension_semantics=("parallel", "parallel"), vmem_limit_bytes=_VMEM_LIMIT),
    )(record_len_dev, feat_pad, mask_pad)
    return out


# ----------------------------- Model -----------------------------

def init_params(key):
    ks = jax.random.split(key, 10)
    p = {}
    p['vfe_w'] = jax.random.normal(ks[0], (4, 64)) / np.sqrt(4.0)
    p['vfe_b'] = jnp.zeros((64,), jnp.float32)
    p['conv0_0_w'] = jax.random.normal(ks[1], (64, 64, 3, 3)) / np.sqrt(64 * 9.0)
    p['conv0_1_w'] = jax.random.normal(ks[2], (64, 64, 3, 3)) / np.sqrt(64 * 9.0)
    p['conv1_0_w'] = jax.random.normal(ks[3], (128, 64, 3, 3)) / np.sqrt(64 * 9.0)
    p['conv1_1_w'] = jax.random.normal(ks[4], (128, 128, 3, 3)) / np.sqrt(128 * 9.0)
    p['deblock0_w'] = jax.random.normal(ks[5], (128, 64, 1, 1)) / np.sqrt(64.0)
    p['deblock1_w'] = jax.random.normal(ks[6], (128, 128, 2, 2)) / np.sqrt(128.0)  # (Cin,Cout,2,2)
    p['cls_w'] = jax.random.normal(ks[7], (2, 256, 1, 1)) / np.sqrt(256.0)
    p['cls_b'] = jnp.zeros((2,), jnp.float32)
    p['reg_w'] = jax.random.normal(ks[8], (14, 256, 1, 1)) / np.sqrt(256.0)
    p['reg_b'] = jnp.zeros((14,), jnp.float32)
    return p


def point_pillar_where2comm_forward(params, voxel_features, voxel_coords,
                                    voxel_num_points, record_len,
                                    pairwise_t_matrix, grid_hw=(16, 16),
                                    score_threshold=0.01):
    H, W = grid_hw
    record_len = np.asarray(record_len)           # host/static (matches .cpu() in the reference)
    Nag = int(record_len.sum())
    B = len(record_len)
    Lmax = int(record_len.max())
    HW = H * W
    zb64 = jnp.zeros((64,), jnp.float32)
    zb128 = jnp.zeros((128,), jnp.float32)

    # 1) PillarVFE -> bf16 pillar features
    pillar_feats = pillar_vfe(voxel_features, voxel_num_points,
                              params['vfe_w'], params['vfe_b'])          # (P, 64) bf16

    # 2) PointPillarScatter (glue): coords = [agent, z, y, x]
    canvas = jnp.zeros((Nag, H, W, 64), jnp.bfloat16)
    canvas = canvas.at[voxel_coords[:, 0], voxel_coords[:, 2],
                       voxel_coords[:, 3]].set(pillar_feats)

    # 3) BaseBEVBackbone (bf16 activations end-to-end)
    x0 = conv3x3(canvas, params['conv0_0_w'], zb64, stride=1, relu=True)
    x0 = conv3x3(x0, params['conv0_1_w'], zb64, stride=1, relu=True)
    x1 = conv3x3(x0, params['conv1_0_w'], zb128, stride=2, relu=True)
    x1 = conv3x3(x1, params['conv1_1_w'], zb128, stride=1, relu=True)
    spatial_features_2d = upsample_concat(x0, x1, params['deblock0_w'], zb128,
                                          params['deblock1_w'], zb128)   # (Nag, H, W, 256) bf16

    # 4) Fused cls+reg heads (128-lane padded) + Where2comm confidence masks
    head_w = jnp.concatenate([params['cls_w'].reshape(2, 256).T,
                              params['reg_w'].reshape(14, 256).T], axis=1)   # (256, 16)
    head_b = jnp.concatenate([params['cls_b'], params['reg_b']])
    head_w_p = jnp.pad(head_w, ((0, 0), (0, 128 - 16)))
    head_b_p = jnp.pad(head_b, (0, 128 - 16))

    cum = np.cumsum(record_len)
    starts = np.concatenate([[0], cum[:-1]])
    ego_flag = np.zeros((Nag,), np.int32)
    ego_flag[starts.astype(np.int64)] = 1                    # first agent of each sample = ego
    ego_flags = jnp.asarray(ego_flag)

    feat_flat = spatial_features_2d.reshape(Nag, HW, 256)
    heads_single = heads_with_mask(feat_flat, ego_flags, head_w_p, head_b_p,
                                   n_cls=2, threshold=score_threshold)    # (Nag, HW, 128)
    psm_single = heads_single[..., 0:2].reshape(Nag, H, W, 2)
    rm_single = heads_single[..., 2:16].reshape(Nag, H, W, 14)
    communication_rates = jnp.mean(heads_single[..., 16])                 # rate from pre-override mask
    mask_flat = heads_single[..., 17:18]                                  # (Nag, HW, 1), ego forced 1

    # 5) Where2comm AttFusion (single-scale; identity pairwise transforms; mask applied in-kernel)
    feat_groups, mask_groups = [], []
    for bi in range(B):
        s, e = int(starts[bi]), int(cum[bi])
        padn = Lmax - (e - s)
        feat_groups.append(jnp.pad(feat_flat[s:e], ((0, padn), (0, 0), (0, 0))))
        mask_groups.append(jnp.pad(mask_flat[s:e], ((0, padn), (0, 0), (0, 0))))
    feat_pad = jnp.stack(feat_groups)                                     # (B, Lmax, HW, 256) bf16
    mask_pad = jnp.stack(mask_groups)                                     # (B, Lmax, HW, 1) f32
    fused_flat = att_fusion(feat_pad, mask_pad, jnp.asarray(record_len, jnp.int32))

    # 6) Heads on fused feature (same padded weights, lane-dense GEMM, f32 outputs)
    heads_fused = gemm_bias(fused_flat.reshape(B * HW, 256), head_w_p, head_b_p,
                            out_dtype=jnp.float32)
    psm = heads_fused[:, 0:2].reshape(B, H, W, 2)
    rm = heads_fused[:, 2:16].reshape(B, H, W, 14)

    to_nchw = lambda t: jnp.transpose(t, (0, 3, 1, 2))
    return {'psm': to_nchw(psm), 'rm': to_nchw(rm),
            'psm_single': to_nchw(psm_single), 'rm_single': to_nchw(rm_single),
            'comm_rate': communication_rates}


# ----------------------------- Main -----------------------------

if __name__ == "__main__":
    key = jax.random.PRNGKey(0)
    kp, kf, kn = jax.random.split(key, 3)

    P, Mpts, H, W = 48, 8, 16, 16
    record_len = np.array([2, 1], np.int32)        # 2 samples, 3 agents total
    Nag = int(record_len.sum())
    B, Lmax = len(record_len), int(record_len.max())

    voxel_features = jax.random.normal(kf, (P, Mpts, 4), jnp.float32)
    # deterministic, UNIQUE (agent, y, x) pillar coordinates (scatter is last-write-wins)
    flat = (np.arange(P) * (Nag * H * W // P)).astype(np.int32)
    agent_idx = flat // (H * W)
    ys = (flat % (H * W)) // W
    xs = flat % W
    voxel_coords = jnp.asarray(np.stack([agent_idx, np.zeros(P, np.int32), ys, xs], axis=1))
    voxel_num_points = jax.random.randint(kn, (P,), 1, Mpts + 1).astype(jnp.int32)
    pairwise_t_matrix = jnp.broadcast_to(jnp.eye(4, dtype=jnp.float32),
                                         (B, Lmax, Lmax, 4, 4))

    params = init_params(kp)
    out = point_pillar_where2comm_forward(
        params, voxel_features, voxel_coords, voxel_num_points,
        record_len, pairwise_t_matrix, grid_hw=(H, W))

    jax.block_until_ready(out['psm'])
    jax.block_until_ready(out['rm'])
    jax.block_until_ready(out['comm_rate'])
    assert out['psm'].shape == (B, 2, H, W)
    assert out['rm'].shape == (B, 14, H, W)
    assert out['psm_single'].shape == (Nag, 2, H, W)
    assert out['rm_single'].shape == (Nag, 14, H, W)
    print("KERNEL_OK")
</pallas_src>

<mosaic_0001>
module attributes {stable_mosaic.version = 11 : i64} {
  func.func @_pillar_vfe_kernel(%arg0: i32, %arg1: memref<48x8x4xf32, #tpu.memory_space<vmem>>, %arg2: memref<48x1xi32, #tpu.memory_space<vmem>>, %arg3: memref<4x64xbf16, #tpu.memory_space<vmem>>, %arg4: memref<1x64xf32, #tpu.memory_space<vmem>>, %arg5: memref<48x64xbf16, #tpu.memory_space<vmem>>) attributes {dimension_semantics = [#tpu.dimension_semantics<parallel>], iteration_bounds = array<i64: 1>, scalar_prefetch = 0 : i64, scratch_operands = 0 : i64, tpu.core_type = #tpu.core_type<tc>, window_params = [{transform_indices = @transform_0, window_bounds = array<i64: 48, 8, 4>}, {transform_indices = @transform_1, window_bounds = array<i64: 48, 1>}, {pipeline_mode = #tpu.pipeline_mode<synchronous>, transform_indices = @transform_2, window_bounds = array<i64: 4, 64>}, {pipeline_mode = #tpu.pipeline_mode<synchronous>, transform_indices = @transform_3, window_bounds = array<i64: 1, 64>}, {transform_indices = @transform_4, window_bounds = array<i64: 48, 64>}]} {
    %0 = tpu.iota {dimensions = array<i32: 1>} : vector<48x8x1xi32>
    %c0 = arith.constant 0 : index
    %c0_0 = arith.constant 0 : index
    %1 = vector.load %arg2[%c0, %c0_0] : memref<48x1xi32, #tpu.memory_space<vmem>>, vector<48x1xi32>
    %2 = vector.shape_cast %1 : vector<48x1xi32> to vector<48x1x1xi32>
    %3 = vector.broadcast %2 : vector<48x1x1xi32> to vector<48x8x1xi32>
    %4 = arith.cmpi slt, %0, %3 : vector<48x8x1xi32>
    %5 = arith.extui %4 : vector<48x8x1xi1> to vector<48x8x1xi32>
    %6 = arith.sitofp %5 : vector<48x8x1xi32> to vector<48x8x1xf32>
    %c0_1 = arith.constant 0 : index
    %c0_2 = arith.constant 0 : index
    %c0_3 = arith.constant 0 : index
    %7 = vector.load %arg1[%c0_1, %c0_2, %c0_3] : memref<48x8x4xf32, #tpu.memory_space<vmem>>, vector<48x8x4xf32>
    %8 = vector.broadcast %6 : vector<48x8x1xf32> to vector<48x8x4xf32>
    %9 = arith.mulf %7, %8 : vector<48x8x4xf32>
    %10 = vector.shape_cast %9 : vector<48x8x4xf32> to vector<384x4xf32>
    %11 = arith.truncf %10 : vector<384x4xf32> to vector<384x4xbf16>
    %c0_4 = arith.constant 0 : index
    %c0_5 = arith.constant 0 : index
    %12 = vector.load %arg3[%c0_4, %c0_5] : memref<4x64xbf16, #tpu.memory_space<vmem>>, vector<4x64xbf16>
    %cst = arith.constant dense<0.000000e+00> : vector<384x64xf32>
    %13 = tpu.matmul %11, %12, %cst {dimension_numbers = #tpu.dot_dimension_numbers<[1], [0], [0], [1], [0, 0, 1, 1], [], []>} : vector<384x4xbf16>, vector<4x64xbf16>, vector<384x64xf32> -> vector<384x64xf32>
    %c0_6 = arith.constant 0 : index
    %c0_7 = arith.constant 0 : index
    %14 = vector.load %arg4[%c0_6, %c0_7] : memref<1x64xf32, #tpu.memory_space<vmem>>, vector<1x64xf32>
    %15 = vector.broadcast %14 : vector<1x64xf32> to vector<384x64xf32>
    %16 = arith.addf %13, %15 : vector<384x64xf32>
    %cst_8 = arith.constant 0.000000e+00 : f32
    %17 = vector.broadcast %cst_8 : f32 to vector<384x64xf32>
    %18 = arith.maximumf %16, %17 : vector<384x64xf32>
    %19 = vector.shape_cast %18 : vector<384x64xf32> to vector<48x8x64xf32>
    %cst_9 = arith.constant dense<0xFF800000> : vector<48x64xf32>
    %20 = vector.multi_reduction <maximumf>, %19, %cst_9 [1] : vector<48x8x64xf32> to vector<48x64xf32>
    %21 = arith.truncf %20 : vector<48x64xf32> to vector<48x64xbf16>
    %c0_10 = arith.constant 0 : index
    %c0_11 = arith.constant 0 : index
    %22 = vector.load %arg5[%c0_10, %c0_11] : memref<48x64xbf16, #tpu.memory_space<vmem>>, vector<48x64xbf16>
    tpu.vector_store %arg5[%c0_10, %c0_11], %21 {strides = array<i32>} : memref<48x64xbf16, #tpu.memory_space<vmem>>, vector<48x64xbf16>,
    return
  }
  func.func @transform_0(%arg0: i32) -> (i32, i32, i32) {
    %c0_i32 = arith.constant 0 : i32
    %c0_i32_0 = arith.constant 0 : i32
    %c0_i32_1 = arith.constant 0 : i32
    return %arg0, %c0_i32, %c0_i32_0 : i32, i32, i32
  }
  func.func @transform_1(%arg0: i32) -> (i32, i32) {
    %c0_i32 = arith.constant 0 : i32
    %c0_i32_0 = arith.constant 0 : i32
    return %arg0, %c0_i32 : i32, i32
  }
  func.func @transform_2(%arg0: i32) -> (i32, i32) {
    %c0_i32 = arith.constant 0 : i32
    %c0_i32_0 = arith.constant 0 : i32
    %c0_i32_1 = arith.constant 0 : i32
    return %c0_i32, %c0_i32_0 : i32, i32
  }
  func.func @transform_3(%arg0: i32) -> (i32, i32) {
    %c0_i32 = arith.constant 0 : i32
    %c0_i32_0 = arith.constant 0 : i32
    %c0_i32_1 = arith.constant 0 : i32
    return %c0_i32, %c0_i32_0 : i32, i32
  }
  func.func @transform_4(%arg0: i32) -> (i32, i32) {
    %c0_i32 = arith.constant 0 : i32
    %c0_i32_0 = arith.constant 0 : i32
    return %arg0, %c0_i32 : i32, i32
  }
}

</mosaic_0001>

<bundles_post_ra>
// kernel: tpu_custom_call.1
= control target key start
LH: loop header
LB: loop body
LE: loop exit
PB: predicated region body
PF: predicated region fallthrough
CT: control target
= control target key end

     0   :  { %9 = vsyncpa [#allocation3], 0  ;;  %s3221_s0 = inlined_call_operand.hbm [shape: f32[48,8,4], index: 0, kind: input, shape index: {}]   ;;  %s3222_s1 = inlined_call_operand.hbm [shape: s32[48,1], index: 1, kind: input, shape index: {}]   ;;  %s3223_s2 = inlined_call_operand.hbm [shape: bf16[4,64], index: 2, kind: input, shape index: {}]   ;;  %s3224_s3 = inlined_call_operand.hbm [shape: f32[1,64], index: 3, kind: input, shape index: {}]   ;;  %s3225_s4 = inlined_call_operand.hbm [shape: bf16[48,64], index: 4, kind: output, shape index: {}]  }
   0x1   :  { %10 = vsyncpa [#allocation6], 0 }
   0x2   :  { %11 = vsyncpa [#allocation9], 0 }
   0x3   :  { %12 = vsyncpa [#allocation4], 0  ;;  %s2597_s15 = smov [#allocation5]   ;;  %s2598_s17 = smov [#allocation2]  }
   0x4   :  { %s30_s16 = sshll.u32 %s2597_s15, 4  ;;  %s18_s18 = sshll.u32 %s2598_s17, 4  ;;  %s31_s16 = int_to_ptr.vmem [resolvable:$true] %s30_s16  ;;  %s2634_s18 = int_to_ptr.vmem [resolvable:$true] %s18_s18 }
   0x5   :  { %s2479_s21 = scalar_lea.hbm %s3222_s1, 768 }
   0x6   :  { %p2480_p0 = scmp.ne.s32.totalorder %s3222_s1, %s2479_s21  ;;  %p2483_p1 = scmp.lt.u32.totalorder %s2479_s21, %s3222_s1 }
   0x8   :  { %p2485_p2 = pnand %p2483_p1, %p2480_p0 }
   0xa   :  { %2488 = shalt.err (!%p2485_p2)
}
   0xb   :  { %s2489_s26 = scalar_lea.vmem %s31_s16, 768  ;;  %p2494_p4 = scmp.lt.s32.totalorder %s31_s16, %s31_s16 }
   0xc   :  { %p2490_p3 = scmp.ne.s32.totalorder %s31_s16, %s2489_s26  ;;  %p2495_p5 = scmp.lt.s32.totalorder %s2489_s26, %s2489_s26 }
   0xe   :  { %p2496_p6 = por %p2495_p5, %p2494_p4 }
  0x10   :  { %p2497_p7 = pnand %p2496_p6, %p2490_p3 }
  0x12   :  { %2500 = shalt.err (!%p2497_p7)
}
  0x13   :  { %s2599_s27 = smov 128   ;;  %s2600_s28 = smov 8  }
  0x14   :  { %36 = dma.hbm_to_vmem [thread:$0]  %s3222_s1, 768, %s31_s16, [#allocation6], %s2599_s27, %s2599_s27, %s2600_s28  }
  0x15   :  { %s2501_s7 = scalar_lea.hbm %s3221_s0, 6144 }
  0x16   :  { %p2502_p8 = scmp.ne.s32.totalorder %s3221_s0, %s2501_s7  ;;  %p2505_p9 = scmp.lt.u32.totalorder %s2501_s7, %s3221_s0 }
  0x18   :  { %p2507_p10 = pnand %p2505_p9, %p2502_p8 }
  0x1a   :  { %2510 = shalt.err (!%p2507_p10)
}
  0x1b   :  { %s2511_s12 = scalar_lea.vmem %s2634_s18, 6144  ;;  %p2516_p12 = scmp.lt.s32.totalorder %s2634_s18, %s2634_s18 }
  0x1c   :  { %p2512_p11 = scmp.ne.s32.totalorder %s2634_s18, %s2511_s12  ;;  %p2517_p13 = scmp.lt.s32.totalorder %s2511_s12, %s2511_s12 }
  0x1e   :  { %p2518_p0 = por %p2517_p13, %p2516_p12 }
  0x20   :  { %p2519_p1 = pnand %p2518_p0, %p2512_p11 }
  0x22   :  { %2522 = shalt.err (!%p2519_p1)
}
  0x23   :  { %24 = dma.hbm_to_vmem [thread:$0]  %s3221_s0, 6144, %s2634_s18, [#allocation3], %s2599_s27, %s2599_s27, %s2600_s28  }
  0x24   :  { %s2601_s14 = smov [#allocation7]   ;;  %s2602_s16 = smov [#allocation8]  }
  0x25   :  { %s43_s15 = sshll.u32 %s2601_s14, 4  ;;  %s53_s17 = sshll.u32 %s2602_s16, 4  ;;  %s44_s15 = int_to_ptr.vmem [resolvable:$true] %s43_s15  ;;  %s54_s17 = int_to_ptr.vmem [resolvable:$true] %s53_s17 }
  0x26   :  { %s2523_s21 = scalar_lea.hbm %s3223_s2, 32 }
  0x27   :  { %p2524_p2 = scmp.ne.s32.totalorder %s3223_s2, %s2523_s21  ;;  %p2527_p3 = scmp.lt.u32.totalorder %s2523_s21, %s3223_s2 }
  0x29   :  { %p2529_p4 = pnand %p2527_p3, %p2524_p2 }
  0x2b   :  { %2532 = shalt.err (!%p2529_p4)
}
  0x2c   :  { %s2533_s0 = scalar_lea.vmem %s44_s15, 32  ;;  %p2538_p6 = scmp.lt.s32.totalorder %s44_s15, %s44_s15 }
  0x2d   :  { %p2534_p5 = scmp.ne.s32.totalorder %s44_s15, %s2533_s0  ;;  %p2539_p7 = scmp.lt.s32.totalorder %s2533_s0, %s2533_s0 }
  0x2f   :  { %p2540_p8 = por %p2539_p7, %p2538_p6 }
  0x31   :  { %p2541_p9 = pnand %p2540_p8, %p2534_p5 }
  0x33   :  { %2544 = shalt.err (!%p2541_p9)
}
  0x34   :  { %46 = dma.hbm_to_vmem [thread:$0]  %s3223_s2, 32, %s44_s15, [#allocation6]  }
  0x35   :  { %s2545_s29 = scalar_lea.hbm %s3224_s3, 16 }
  0x36   :  { %p2546_p10 = scmp.ne.s32.totalorder %s3224_s3, %s2545_s29  ;;  %p2549_p11 = scmp.lt.u32.totalorder %s2545_s29, %s3224_s3 }
  0x38   :  { %p2551_p12 = pnand %p2549_p11, %p2546_p10 }
  0x3a   :  { %2554 = shalt.err (!%p2551_p12)
}
  0x3b   :  { %s2555_s8 = scalar_lea.vmem %s54_s17, 16  ;;  %s2559_s9 = scalar_lea.vmem %s54_s17, 32 }
  0x3c   :  { %p2556_p13 = scmp.ne.s32.totalorder %s54_s17, %s2555_s8  ;;  %p2560_p0 = scmp.lt.s32.totalorder %s54_s17, %s54_s17 }
  0x3d   :  { %p2561_p1 = scmp.lt.s32.totalorder %s2559_s9, %s2555_s8 }
  0x3f   :  { %p2562_p2 = por %p2561_p1, %p2560_p0 }
  0x41   :  { %p2563_p3 = pnand %p2562_p2, %p2556_p13 }
  0x43   :  { %2566 = shalt.err (!%p2563_p3)
}
  0x44   :  { %56 = dma.hbm_to_vmem [thread:$0]  %s3224_s3, 16, %s54_s17, [#allocation9]  }
  0x45   :  { %2589 = dma.done.wait [#allocation3], 6144  }
  0x46   :  { %2590 = vsyncadd [#allocation3], 4294961152 }
  0x47   :  { %2591 = dma.done.wait [#allocation6], 800  }
  0x48   :  { %2592 = vsyncadd [#allocation6], 4294966496 }
  0x49   :  { %2593 = dma.done.wait [#allocation9], 16  }
  0x4a   :  { %2594 = vsyncadd [#allocation9], 4294967280  ;;  %v70_v0 = vlaneseq  ;;  %v2603_v1 = vmov 0   ;;  %v2604_v2 = vmov 1966171168   ;;  %v72_v7 = vld [vmem:[#allocation5] sm:$0xff] }
  0x4b   :  { %2350 = vset.pattern.permute.xlu0 %v2603_v1  ;;  %v80_v3 = vunpack.c.l.s4 %v2604_v2  ;;  %2361 = vset.pattern.permute.xlu1 %v2603_v1  ;;  %v75_v9 = vld [vmem:[#allocation5 + $0x18] sm:$0xff]  ;;  %v2697_v10 = vld [vmem:[#allocation5 + $0x8] sm:$0xff]  ;;  %v78_v12 = vcombine.high %v72_v7, %v72_v7  ;;  %v2701_v15 = vld [vmem:[#allocation5 + $0x20] sm:$0xff]  ;;  %v2605_v39 = vmov 0.0   ;;  %s2606_s3 = smov [#allocation10]  }
  0x4c   :  { %v2689_v4 = vshrl.u32 %v70_v0, 7  ;;  %v225_v14 = vcombine.high %v75_v9, %v75_v9  ;;  %v127_v18 = vcombine.high %v2697_v10, %v2697_v10  ;;  %v274_v19 = vcombine.high %v2701_v15, %v2701_v15  ;;  %s2076_s11 = sshll.u32 %s2606_s3, 4  ;;  %s2077_s11 = int_to_ptr.vmem [resolvable:$true] %s2076_s11 }
  0x4d   :  { %v81_v5 = vunpack.c.0.s8 %v80_v3  ;;  %s2567_s12 = scalar_lea.vmem %s2077_s11, 384  ;;  %p2572_p5 = scmp.lt.s32.totalorder %s2077_s11, %s2077_s11 }
  0x4e   :  { %v2695_v8 = vsub.s32 0, %v2689_v4  ;;  %p2568_p4 = scmp.ne.s32.totalorder %s2077_s11, %s2567_s12  ;;  %p2573_p6 = scmp.lt.s32.totalorder %s2567_s12, %s2567_s12 }
  0x4f   :  { %v2692_v6 = vsub.s32 %v81_v5, %v2689_v4 }
  0x50   :  { %p2574_p7 = por %p2573_p6, %p2572_p5 }
  0x51   :  { %v85_v11 = vrot.slane %v72_v7, %v2692_v6  ;;  %v232_v13 = vrot.slane %v75_v9, %v2692_v6  ;;  %v2705_v16 = vrot.slane %v2697_v10, %v2692_v6  ;;  %v2709_v17 = vrot.slane %v2701_v15, %v2692_v6 }
  0x52   :  { %v92_v24 = vrot.slane %v78_v12, %v2692_v6  ;;  %v239_v25 = vrot.slane %v225_v14, %v2692_v6  ;;  %p2575_p8 = pnand %p2574_p7, %p2568_p4 }
  0x53   :  { %v93_v20 = vcombine.high %v85_v11, %v85_v11  ;;  %v101_v21 = vrot.slane %v85_v11, %v2692_v6  ;;  %v240_v22 = vcombine.high %v232_v13, %v232_v13  ;;  %v248_v23 = vrot.slane %v232_v13, %v2692_v6 }
  0x54   :  { %v142_v26 = vcombine.high %v2705_v16, %v2705_v16  ;;  %v2723_v27 = vrot.slane %v2705_v16, %v2692_v6  ;;  %v94_v34 = vcombine.high %v92_v24, %v92_v24  ;;  %v108_v35 = vrot.slane %v92_v24, %v2692_v6 }
  0x55   :  { %v115_v28 = vrot.slane %v93_v20, %v2692_v6  ;;  %v375_v29 = vrot.slane %v101_v21, %v2695_v8  ;;  %v123_v30 = vcombine.high %v101_v21, %v101_v21  ;;  %v262_v31 = vrot.slane %v240_v22, %v2692_v6 }
  0x56   :  { %v471_v32 = vrot.slane %v248_v23, %v2695_v8  ;;  %v270_v33 = vcombine.high %v248_v23, %v248_v23  ;;  %v122_v53 = vrot.slane %v94_v34, %v2692_v6  ;;  %v391_v56 = vrot.slane %v108_v35, %v2695_v8 }
  0x57   :  { %v379_v36 = vrot.slane %v115_v28, %v2695_v8  ;;  %vm564_vm0 = vcmp.lt.s32.totalorder %v2689_v4, %v375_v29  ;;  %v125_v37 = vcombine.high %v115_v28, %v115_v28  ;;  %v383_v38 = vrot.slane %v123_v30, %v2695_v8 }
  0x58   :  { %v2090_v40 = vsel %vm564_vm0, 1.0, %v2605_v39  ;;  %v475_v41 = vrot.slane %v262_v31, %v2695_v8  ;;  %vm588_vm1 = vcmp.lt.s32.totalorder %v2689_v4, %v471_v32  ;;  %v272_v42 = vcombine.high %v262_v31, %v262_v31 }
  0x59   :  { %vm565_vm2 = vcmp.lt.s32.totalorder %v2689_v4, %v379_v36  ;;  %v387_v43 = vrot.slane %v125_v37, %v2695_v8  ;;  %vm566_vm3 = vcmp.lt.s32.totalorder %v2689_v4, %v383_v38  ;;  %v2114_v44 = vsel %vm588_vm1, 1.0, %v2605_v39 }
  0x5a   :  { %v2091_v45 = vsel %vm565_vm2, 1.0, %v2605_v39  ;;  %v2092_v46 = vsel %vm566_vm3, 1.0, %v2605_v39  ;;  %vm589_vm4 = vcmp.lt.s32.totalorder %v2689_v4, %v475_v41  ;;  %v479_v47 = vrot.slane %v270_v33, %v2695_v8 }
  0x5b   :  { %v2351_v48 = vpack.i.bf16 %v2091_v45, %v2090_v40  ;;  %vm567_vm5 = vcmp.lt.s32.totalorder %v2689_v4, %v387_v43  ;;  %v2115_v49 = vsel %vm589_vm4, 1.0, %v2605_v39  ;;  %v483_v50 = vrot.slane %v272_v42, %v2695_v8 }
  0x5c   :  { %v2093_v51 = vsel %vm567_vm5, 1.0, %v2605_v39  ;;  %v2356_v52 = vpack.i.bf16 %v2115_v49, %v2114_v44  ;;  %vm590_vm6 = vcmp.lt.s32.totalorder %v2689_v4, %v479_v47  ;;  %v395_v58 = vrot.slane %v122_v53, %v2695_v8 }
  0x5d   :  { %2352 = vperm.xlu0 %2350, %v2351_v48   ;;  %v2362_v54 = vpack.i.bf16 %v2093_v51, %v2092_v46  ;;  %vm591_vm7 = vcmp.lt.s32.totalorder %v2689_v4, %v483_v50  ;;  %v2116_v55 = vsel %vm590_vm6, 1.0, %v2605_v39  ;;  %v241_v59 = vcombine.high %v239_v25, %v239_v25  ;;  %v2810_v51 = vld [vmem:[#allocation5 + $0x10] sm:$0xff] }
  0x5e   :  { %v2117_v57 = vsel %vm591_vm7, 1.0, %v2605_v39  ;;  %v255_v60 = vrot.slane %v239_v25, %v2692_v6  ;;  %vm568_vm8 = vcmp.lt.s32.totalorder %v2689_v4, %v391_v56  ;;  %v124_v62 = vcombine.high %v108_v35, %v108_v35 }
  0x5f   :  { %2363 = vperm.xlu1 %2361, %v2362_v54   ;;  %v2367_v61 = vpack.i.bf16 %v2117_v57, %v2116_v55  ;;  %v126_v63 = vcombine.high %v122_v53, %v122_v53  ;;  %vm569_vm9 = vcmp.lt.s32.totalorder %v2689_v4, %v395_v58  ;;  %v2094_v0 = vsel %vm568_vm8, 1.0, %v2605_v39  ;;  %v2824_v58 = vld [vmem:[#allocation7] sm:$0x3] }
  0x60   :  { %v269_v1 = vrot.slane %v241_v59, %v2692_v6  ;;  %v487_v2 = vrot.slane %v255_v60, %v2695_v8  ;;  %v2095_v3 = vsel %vm569_vm9, 1.0, %v2605_v39  ;;  %v399_v5 = vrot.slane %v124_v62, %v2695_v8 }
  0x61   :  { %2357 = vperm.xlu0 %2350, %v2356_v52   ;;  %v403_v7 = vrot.slane %v126_v63, %v2695_v8  ;;  %v271_v9 = vcombine.high %v255_v60, %v255_v60  ;;  %v2372_v11 = vpack.i.bf16 %v2095_v3, %v2094_v0  ;;  %v164_v28 = vrot.slane %v142_v26, %v2692_v6 }
  0x62   :  { %v491_v12 = vrot.slane %v269_v1, %v2695_v8  ;;  %vm592_vm10 = vcmp.lt.s32.totalorder %v2689_v4, %v487_v2  ;;  %v273_v13 = vcombine.high %v269_v1, %v269_v1  ;;  %vm570_vm11 = vcmp.lt.s32.totalorder %v2689_v4, %v399_v5 }
  0x63   :  { %2368 = vperm.xlu1 %2361, %v2367_v61   ;;  %v2118_v14 = vsel %vm592_vm10, 1.0, %v2605_v39  ;;  %vm571_vm12 = vcmp.lt.s32.totalorder %v2689_v4, %v403_v7  ;;  %v495_v20 = vrot.slane %v271_v9, %v2695_v8  ;;  %v2096_v21 = vsel %vm570_vm11, 1.0, %v2605_v39 }
  0x64   :  { %vm593_vm13 = vcmp.lt.s32.totalorder %v2689_v4, %v491_v12  ;;  %v2097_v22 = vsel %vm571_vm12, 1.0, %v2605_v39  ;;  %v499_v23 = vrot.slane %v273_v13, %v2695_v8  ;;  %v407_v31 = vrot.slane %v2723_v27, %v2695_v8 }
  0x65   :  { %2373 = vperm.xlu0 %2350, %v2372_v11   ;;  %v2119_v24 = vsel %vm593_vm13, 1.0, %v2605_v39  ;;  %v2382_v25 = vpack.i.bf16 %v2097_v22, %v2096_v21  ;;  %vm594_vm14 = vcmp.lt.s32.totalorder %v2689_v4, %v495_v20  ;;  %v411_v33 = vrot.slane %v164_v28, %v2695_v8 }
  0x66   :  { %v2377_v29 = vpack.i.bf16 %v2119_v24, %v2118_v14  ;;  %vm595_vm15 = vcmp.lt.s32.totalorder %v2689_v4, %v499_v23  ;;  %v2120_v30 = vsel %vm594_vm14, 1.0, %v2605_v39  ;;  %v289_v34 = vcombine.high %v2709_v17, %v2709_v17 }
  0x67   :  { %v2121_v32 = vsel %vm595_vm15, 1.0, %v2605_v39  ;;  %v297_v35 = vrot.slane %v2709_v17, %v2692_v6  ;;  %vm572_vm0 = vcmp.lt.s32.totalorder %v2689_v4, %v407_v31  ;;  %v172_v26 = vcombine.high %v2723_v27, %v2723_v27  ;;  %v77_v31 = vld [vmem:[#allocation5 + $0x28] sm:$0xff] }
  0x68   :  { %2378 = vperm.xlu1 %2361, %v2377_v29   ;;  %v2392_v16 = vpack.i.bf16 %v2121_v32, %v2120_v30  ;;  %v174_v36 = vcombine.high %v164_v28, %v164_v28  ;;  %vm573_vm1 = vcmp.lt.s32.totalorder %v2689_v4, %v411_v33  ;;  %v2098_v37 = vsel %vm572_vm0, 1.0, %v2605_v39 }
  0x69   :  { %2383 = vperm.xlu0 %2350, %v2382_v25   ;;  %v311_v38 = vrot.slane %v289_v34, %v2692_v6  ;;  %v503_v40 = vrot.slane %v297_v35, %v2695_v8  ;;  %v2099_v41 = vsel %vm573_vm1, 1.0, %v2605_v39  ;;  %v415_v17 = vrot.slane %v172_v26, %v2695_v8 }
  0x6a   :  { %v419_v42 = vrot.slane %v174_v36, %v2695_v8  ;;  %v319_v43 = vcombine.high %v297_v35, %v297_v35  ;;  %v2387_v44 = vpack.i.bf16 %v2099_v41, %v2098_v37  ;;  %v141_v54 = vrot.slane %v127_v18, %v2692_v6 }
  0x6b   :  { %v507_v27 = vrot.slane %v311_v38, %v2695_v8  ;;  %vm596_vm2 = vcmp.lt.s32.totalorder %v2689_v4, %v503_v40  ;;  %v321_v45 = vcombine.high %v311_v38, %v311_v38  ;;  %vm574_vm3 = vcmp.lt.s32.totalorder %v2689_v4, %v415_v17 }
  0x6c   :  { %2393 = vperm.xlu1 %2361, %v2392_v16   ;;  %v2122_v46 = vsel %vm596_vm2, 1.0, %v2605_v39  ;;  %vm575_vm4 = vcmp.lt.s32.totalorder %v2689_v4, %v419_v42  ;;  %v511_v47 = vrot.slane %v319_v43, %v2695_v8  ;;  %v2100_v48 = vsel %vm574_vm3, 1.0, %v2605_v39 }
  0x6d   :  { %2388 = vperm.xlu0 %2350, %v2387_v44   ;;  %vm597_vm5 = vcmp.lt.s32.totalorder %v2689_v4, %v507_v27  ;;  %v2101_v49 = vsel %vm575_vm4, 1.0, %v2605_v39  ;;  %v515_v50 = vrot.slane %v321_v45, %v2695_v8  ;;  %v288_v57 = vrot.slane %v274_v19, %v2692_v6 }
  0x6e   :  { %v2123_v52 = vsel %vm597_vm5, 1.0, %v2605_v39  ;;  %v2402_v53 = vpack.i.bf16 %v2101_v49, %v2100_v48  ;;  %vm598_vm6 = vcmp.lt.s32.totalorder %v2689_v4, %v511_v47  ;;  %v143_v60 = vcombine.high %v141_v54, %v141_v54 }
  0x6f   :  { %v2397_v55 = vpack.i.bf16 %v2123_v52, %v2122_v46  ;;  %vm599_vm7 = vcmp.lt.s32.totalorder %v2689_v4, %v515_v50  ;;  %v2124_v56 = vsel %vm598_vm6, 1.0, %v2605_v39  ;;  %v157_v61 = vrot.slane %v141_v54, %v2692_v6 }
  0x70   :  { %v2125_v59 = vsel %vm599_vm7, 1.0, %v2605_v39  ;;  %v183_v10 = vrot.slane %v2810_v51, %v2692_v6  ;;  %v290_v62 = vcombine.high %v288_v57, %v288_v57  ;;  %v304_v63 = vrot.slane %v288_v57, %v2692_v6 }
  0x71   :  { %2398 = vperm.xlu1 %2361, %v2397_v55   ;;  %2403 = vperm.xlu0 %2350, %v2402_v53   ;;  %v2407_v18 = vpack.i.bf16 %v2125_v59, %v2124_v56  ;;  %vm1149_vm8 = vcmask 1041408   ;;  %v171_v15 = vrot.slane %v143_v60, %v2692_v6  ;;  %v423_v19 = vrot.slane %v157_v61, %v2695_v8 }
  0x72   :  { %v173_v0 = vcombine.high %v157_v61, %v157_v61  ;;  %v191_v1 = vcombine.high %v183_v10, %v183_v10  ;;  %2336 = vmatprep.subr.msk.bf16.mxu0 %vm1149_vm8, %v2824_v58  ;;  %v318_v2 = vrot.slane %v290_v62, %v2692_v6  ;;  %v519_v3 = vrot.slane %v304_v63, %v2695_v8 }
  0x73   :  { %v320_v5 = vcombine.high %v304_v63, %v304_v63  ;;  %v199_v7 = vrot.slane %v183_v10, %v2692_v6  ;;  %2337 = vmatprep.subr.msk.bf16.mxu1 %vm1149_vm8, %v2824_v58  ;;  %v427_v9 = vrot.slane %v171_v15, %v2695_v8  ;;  %vm576_vm9 = vcmp.lt.s32.totalorder %v2689_v4, %v423_v19 }
  0x74   :  { %v175_v11 = vcombine.high %v171_v15, %v171_v15  ;;  %v431_v12 = vrot.slane %v173_v0, %v2695_v8  ;;  %v2102_v13 = vsel %vm576_vm9, 1.0, %v2605_v39  ;;  %v523_v14 = vrot.slane %v318_v2, %v2695_v8 }
  0x75   :  { %2408 = vperm.xlu1 %2361, %v2407_v18   ;;  %vm600_vm10 = vcmp.lt.s32.totalorder %v2689_v4, %v519_v3  ;;  %v322_v20 = vcombine.high %v318_v2, %v318_v2  ;;  %vm577_vm11 = vcmp.lt.s32.totalorder %v2689_v4, %v427_v9  ;;  %v527_v25 = vrot.slane %v320_v5, %v2695_v8 }
  0x76   :  { %v2126_v21 = vsel %vm600_vm10, 1.0, %v2605_v39  ;;  %v435_v22 = vrot.slane %v175_v11, %v2695_v8  ;;  %vm578_vm12 = vcmp.lt.s32.totalorder %v2689_v4, %v431_v12  ;;  %v2103_v23 = vsel %vm577_vm11, 1.0, %v2605_v39 }
  0x77   :  { %vm601_vm13 = vcmp.lt.s32.totalorder %v2689_v4, %v523_v14  ;;  %v2104_v24 = vsel %vm578_vm12, 1.0, %v2605_v39  ;;  %v2412_v28 = vpack.i.bf16 %v2103_v23, %v2102_v13  ;;  %v531_v30 = vrot.slane %v322_v20, %v2695_v8 }
  0x78   :  { %v2127_v29 = vsel %vm601_vm13, 1.0, %v2605_v39  ;;  %vm579_vm14 = vcmp.lt.s32.totalorder %v2689_v4, %v435_v22  ;;  %vm602_vm15 = vcmp.lt.s32.totalorder %v2689_v4, %v527_v25  ;;  %v213_v34 = vrot.slane %v191_v1, %v2692_v6 }
  0x79   :  { %v2417_v32 = vpack.i.bf16 %v2127_v29, %v2126_v21  ;;  %v2105_v33 = vsel %vm579_vm14, 1.0, %v2605_v39  ;;  %2413 = vperm.xlu0 %2350, %v2412_v28   ;;  %vm603_vm0 = vcmp.lt.s32.totalorder %v2689_v4, %v531_v30  ;;  %v2128_v16 = vsel %vm602_vm15, 1.0, %v2605_v39 }
  0x7a   :  { %v2422_v35 = vpack.i.bf16 %v2105_v33, %v2104_v24  ;;  %v439_v26 = vrot.slane %v199_v7, %v2695_v8  ;;  %v2129_v36 = vsel %vm603_vm0, 1.0, %v2605_v39  ;;  %v443_v37 = vrot.slane %v213_v34, %v2695_v8 }
  0x7b   :  { %2418 = vperm.xlu1 %2361, %v2417_v32   ;;  %v330_v38 = vrot.slane %v77_v31, %v2692_v6  ;;  %v221_v40 = vcombine.high %v199_v7, %v199_v7  ;;  %v2427_v41 = vpack.i.bf16 %v2129_v36, %v2128_v16  ;;  %v223_v17 = vcombine.high %v213_v34, %v213_v34 }
  0x7c   :  { %vm580_vm1 = vcmp.lt.s32.totalorder %v2689_v4, %v439_v26  ;;  %v176_v42 = vcombine.high %v2810_v51, %v2810_v51  ;;  %vm581_vm2 = vcmp.lt.s32.totalorder %v2689_v4, %v443_v37  ;;  %v323_v63 = vcombine.high %v77_v31, %v77_v31 }
  0x7d   :  { %v2106_v43 = vsel %vm580_vm1, 1.0, %v2605_v39  ;;  %v338_v44 = vcombine.high %v330_v38, %v330_v38  ;;  %v346_v27 = vrot.slane %v330_v38, %v2692_v6  ;;  %2423 = vperm.xlu0 %2350, %v2422_v35   ;;  %v2107_v45 = vsel %vm581_vm2, 1.0, %v2605_v39 }
  0x7e   :  { %v447_v46 = vrot.slane %v221_v40, %v2695_v8  ;;  %v451_v47 = vrot.slane %v223_v17, %v2695_v8  ;;  %v190_v48 = vrot.slane %v176_v42, %v2692_v6  ;;  %v2432_v49 = vpack.i.bf16 %v2107_v45, %v2106_v43  ;;  %v709_v17 = vld [vmem:[#allocation2 + $0x8] sm:$0xff]  ;;  %v710_v43 = vld [vmem:[#allocation2 + $0x10] sm:$0xff] }
  0x7f   :  { %2428 = vperm.xlu1 %2361, %v2427_v41   ;;  %v360_v50 = vrot.slane %v338_v44, %v2692_v6  ;;  %v535_v51 = vrot.slane %v346_v27, %v2695_v8  ;;  %v368_v52 = vcombine.high %v346_v27, %v346_v27  ;;  %v337_v7 = vrot.slane %v323_v63, %v2692_v6  ;;  %v708_v41 = vld [vmem:[#allocation2] sm:$0xff]  ;;  %v711_v44 = vld [vmem:[#allocation2 + $0x18] sm:$0xff] }
  0x80   :  { %vm582_vm3 = vcmp.lt.s32.totalorder %v2689_v4, %v447_v46  ;;  %vm583_vm4 = vcmp.lt.s32.totalorder %v2689_v4, %v451_v47  ;;  %v192_v53 = vcombine.high %v190_v48, %v190_v48  ;;  %v206_v54 = vrot.slane %v190_v48, %v2692_v6 }
  0x81   :  { %v539_v55 = vrot.slane %v360_v50, %v2695_v8  ;;  %vm604_vm5 = vcmp.lt.s32.totalorder %v2689_v4, %v535_v51  ;;  %v2108_v56 = vsel %vm582_vm3, 1.0, %v2605_v39  ;;  %v2109_v57 = vsel %vm583_vm4, 1.0, %v2605_v39  ;;  %2433 = vperm.xlu0 %2350, %v2432_v49   ;;  %v732_v49 = vld [vmem:[#allocation2 + $0xc0] sm:$0xff] }
  0x82   :  { %v2130_v59 = vsel %vm604_vm5, 1.0, %v2605_v39  ;;  %v2442_v60 = vpack.i.bf16 %v2109_v57, %v2108_v56  ;;  %v370_v61 = vcombine.high %v360_v50, %v360_v50  ;;  %v543_v10 = vrot.slane %v368_v52, %v2695_v8 }
  0x83   :  { %vm605_vm6 = vcmp.lt.s32.totalorder %v2689_v4, %v539_v55  ;;  %v220_v18 = vrot.slane %v192_v53, %v2692_v6  ;;  %v455_v62 = vrot.slane %v206_v54, %v2695_v8  ;;  %v222_v0 = vcombine.high %v206_v54, %v206_v54  ;;  %v733_v53 = vld [vmem:[#allocation2 + $0xc8] sm:$0xff]  ;;  %v734_v54 = vld [vmem:[#allocation2 + $0xd0] sm:$0xff]  ;;  %v735_v55 = vld [vmem:[#allocation2 + $0xd8] sm:$0xff] }
  0x84   :  { %v2131_v15 = vsel %vm605_vm6, 1.0, %v2605_v39  ;;  %v547_v19 = vrot.slane %v370_v61, %v2695_v8  ;;  %vm606_vm7 = vcmp.lt.s32.totalorder %v2689_v4, %v543_v10  ;;  %v1151_v13 = vsel %vm1149_vm8, %v2824_v58, 0 }
  0x85   :  { %v2437_v1 = vpack.i.bf16 %v2131_v15, %v2130_v59  ;;  %v2132_v2 = vsel %vm606_vm7, 1.0, %v2605_v39  ;;  %v459_v3 = vrot.slane %v220_v18, %v2695_v8  ;;  %vm584_vm9 = vcmp.lt.s32.totalorder %v2689_v4, %v455_v62  ;;  %2443 = vperm.xlu0 %2350, %v2442_v60   ;;  %2285 = vmatpush3.bf16.msra.mxu0 %v1151_v13  ;;  %v713_v62 = vld [vmem:[#allocation2 + $0x28] sm:$0xff] }
  0x86   :  { %vm607_vm10 = vcmp.lt.s32.totalorder %v2689_v4, %v547_v19  ;;  %v2110_v5 = vsel %vm584_vm9, 1.0, %v2605_v39  ;;  %v224_v9 = vcombine.high %v220_v18, %v220_v18  ;;  %v463_v12 = vrot.slane %v222_v0, %v2695_v8  ;;  %2335 = vmatpush3.bf16.msra.mxu1 %v1151_v13  ;;  %v712_v18 = vld [vmem:[#allocation2 + $0x20] sm:$0xff] }
  0x87   :  { %2438 = vperm.xlu1 %2361, %v2437_v1   ;;  %v2133_v11 = vsel %vm607_vm10, 1.0, %v2605_v39  ;;  %vm585_vm11 = vcmp.lt.s32.totalorder %v2689_v4, %v459_v3  ;;  %v339_v21 = vcombine.high %v337_v7, %v337_v7  ;;  %v353_v22 = vrot.slane %v337_v7, %v2692_v6 }
  0x88   :  { %v2447_v14 = vpack.i.bf16 %v2133_v11, %v2132_v2  ;;  %v2111_v20 = vsel %vm585_vm11, 1.0, %v2605_v39  ;;  %v467_v24 = vrot.slane %v224_v9, %v2695_v8  ;;  %vm586_vm12 = vcmp.lt.s32.totalorder %v2689_v4, %v463_v12  ;;  %v736_v11 = vld [vmem:[#allocation2 + $0xe0] sm:$0xff]  ;;  %v737_v12 = vld [vmem:[#allocation2 + $0xe8] sm:$0xff] }
  0x89   :  { %v2452_v23 = vpack.i.bf16 %v2111_v20, %v2110_v5  ;;  %v367_v25 = vrot.slane %v339_v21, %v2692_v6  ;;  %v551_v28 = vrot.slane %v353_v22, %v2695_v8  ;;  %v2112_v29 = vsel %vm586_vm12, 1.0, %v2605_v39  ;;  %v714_v21 = vld [vmem:[#allocation2 + $0x30] sm:$0xff] }
  0x8a   :  { %v369_v58 = vcombine.high %v353_v22, %v353_v22  ;;  %vm587_vm8 = vcmp.lt.s32.totalorder %v2689_v4, %v467_v24  ;;  %vm1076_vm1 = vcmask 31744   ;;  %v715_v22 = vld [vmem:[#allocation2 + $0x38] sm:$0xff]  ;;  %vm1426_vm2 = vcmask 523264  }
  0x8b   :  { %2448 = vperm.xlu1 %2361, %v2447_v14   ;;  %2453 = vperm.xlu0 %2350, %v2452_v23   ;;  %v555_v30 = vrot.slane %v367_v25, %v2695_v8  ;;  %vm608_vm13 = vcmp.lt.s32.totalorder %v2689_v4, %v551_v28  ;;  %v2113_v31 = vsel %vm587_vm8, 1.0, %v2605_v39  ;;  %v371_v32 = vcombine.high %v367_v25, %v367_v25 }
  0x8c   :  { %v2134_v33 = vsel %vm608_vm13, 1.0, %v2605_v39  ;;  %v2462_v34 = vpack.i.bf16 %v2113_v31, %v2112_v29  ;;  %v559_v6 = vrot.slane %v369_v58, %v2695_v8  ;;  %vm2003_vm3 = vcmask 1041409  }
  0x8d   :  { %vm609_vm14 = vcmp.lt.s32.totalorder %v2689_v4, %v555_v30  ;;  %v563_v35 = vrot.slane %v371_v32, %v2695_v8  ;;  %v738_v32 = vld [vmem:[#allocation2 + $0xf0] sm:$0xff]  ;;  %vm2005_vm4 = vcmask 1042434   ;;  %vm2007_vm5 = vcmask 1043459  }
  0x8e   :  { %v2135_v16 = vsel %vm609_vm14, 1.0, %v2605_v39  ;;  %vm610_vm15 = vcmp.lt.s32.totalorder %v2689_v4, %v559_v6  ;;  %vm2009_vm6 = vcmask 1044484   ;;  %vm2011_vm7 = vcmask 1045509  }
  0x8f   :  { %2463 = vperm.xlu0 %2350, %v2462_v34   ;;  %v2457_v26 = vpack.i.bf16 %v2135_v16, %v2134_v33  ;;  %vm611_vm0 = vcmp.lt.s32.totalorder %v2689_v4, %v563_v35  ;;  %v2136_v36 = vsel %vm610_vm15, 1.0, %v2605_v39  ;;  %v739_v33 = vld [vmem:[#allocation2 + $0xf8] sm:$0xff]  ;;  %vm2013_vm9 = vcmask 1046534  }
  0x90   :  { %v2137_v37 = vsel %vm611_vm0, 1.0, %v2605_v39  ;;  %vm2015_vm10 = vcmask 1047559   ;;  %vm2064_vm11 = vcmask 519168  }
  0x91   :  { %2458 = vperm.xlu1 %2361, %v2457_v26   ;;  %v2467_v38 = vpack.i.bf16 %v2137_v37, %v2136_v36  ;;  %v716_v26 = vld [vmem:[#allocation2 + $0x40] sm:$0xff]  ;;  %v717_v36 = vld [vmem:[#allocation2 + $0x48] sm:$0xff] }
  0x95   :  { %2468 = vperm.xlu1 %2361, %v2467_v38  }
  0xdc   :  { %v2353_v40 = vpop.permute.xlu0 %2352 }
  0xdd   :  { %v2355_v42 = vunpack.i.h.bf16 %v2353_v40  ;;  %v2354_v8 = vunpack.i.l.bf16 %v2353_v40 }
  0xde   :  { %v2364_v27 = vpop.permute.xlu1 %2363 }
  0xdf   :  { %v2366_v45 = vunpack.i.h.bf16 %v2364_v27  ;;  %v2365_v46 = vunpack.i.l.bf16 %v2364_v27  ;;  %v996_v47 = vmul.f32 %v2354_v8, %v708_v41  ;;  %v997_v48 = vmul.f32 %v2355_v42, %v709_v17  ;;  %v740_v27 = vld [vmem:[#allocation2 + $0x100] sm:$0xff] }
  0xe0   :  { %v2358_v4 = vpop.permute.xlu0 %2357 }
  0xe1   :  { %v999_v50 = vmul.f32 %v2366_v45, %v711_v44  ;;  %v998_v39 = vmul.f32 %v2365_v46, %v710_v43  ;;  %v2360_v51 = vunpack.i.h.bf16 %v2358_v4  ;;  %v2359_v52 = vunpack.i.l.bf16 %v2358_v4  ;;  %v741_v45 = vld [vmem:[#allocation2 + $0x108] sm:$0xff] }
  0xe2   :  { %v2369_v56 = vpop.permute.xlu1 %2368  ;;  %v1044_v57 = vpack.c.bf16 %v997_v48, %v996_v47  ;;  %v719_v47 = vld [vmem:[#allocation2 + $0x58] sm:$0xff] }
  0xe3   :  { %v1045_v59 = vpack.c.bf16 %v999_v50, %v998_v39  ;;  %v2371_v60 = vunpack.i.h.bf16 %v2369_v56  ;;  %v2370_v61 = vunpack.i.l.bf16 %v2369_v56  ;;  %v1020_v10 = vmul.f32 %v2359_v52, %v732_v49  ;;  %v718_v39 = vld [vmem:[#allocation2 + $0x50] sm:$0xff] }
  0xe4   :  { %2286 = vmatprep.mubr.msk.bf16.mxu0 %vm1076_vm1, %v1044_v57  ;;  %v2374_v63 = vpop.permute.xlu0 %2373  ;;  %v1021_v15 = vmul.f32 %v2360_v51, %v733_v53  ;;  %v742_v57 = vld [vmem:[#allocation2 + $0x110] sm:$0xff] }
  0xe5   :  { %v1023_v19 = vmul.f32 %v2371_v60, %v735_v55  ;;  %v1022_v0 = vmul.f32 %v2370_v61, %v734_v54  ;;  %v2376_v1 = vunpack.i.h.bf16 %v2374_v63  ;;  %v2375_v2 = vunpack.i.l.bf16 %v2374_v63  ;;  %2287 = vmatmul.mubr.msk.bf16.vlgmr.msra.gmra.mrb[0].mxu0 %vm1076_vm1, %v1045_v59  ;;  %v743_v59 = vld [vmem:[#allocation2 + $0x118] sm:$0xff] }
  0xe6   :  { %v1056_v3 = vpack.c.bf16 %v1021_v15, %v1020_v10 }
  0xe7   :  { %v1057_v5 = vpack.c.bf16 %v1023_v19, %v1022_v0  ;;  %v1001_v7 = vmul.f32 %v2376_v1, %v713_v62  ;;  %v1000_v9 = vmul.f32 %v2375_v2, %v712_v18  ;;  %v2379_v13 = vpop.permute.xlu1 %2378  ;;  %v720_v0 = vld [vmem:[#allocation2 + $0x60] sm:$0xff]  ;;  %v721_v1 = vld [vmem:[#allocation2 + $0x68] sm:$0xff] }
  0xe8   :  { %v2381_v14 = vunpack.i.h.bf16 %v2379_v13  ;;  %v2380_v20 = vunpack.i.l.bf16 %v2379_v13  ;;  %2310 = vmatprep.mubr.msk.bf16.mxu1 %vm1076_vm1, %v1056_v3  ;;  %v2384_v23 = vpop.permute.xlu0 %2383 }
  0xe9   :  { %v1046_v24 = vpack.c.bf16 %v1001_v7, %v1000_v9  ;;  %v2386_v25 = vunpack.i.h.bf16 %v2384_v23  ;;  %v2385_v28 = vunpack.i.l.bf16 %v2384_v23  ;;  %2311 = vmatmul.mubr.msk.bf16.vlgmr.msra.gmra.mrb[0].mxu1 %vm1076_vm1, %v1057_v5  ;;  %v744_v7 = vld [vmem:[#allocation2 + $0x120] sm:$0xff]  ;;  %v745_v9 = vld [vmem:[#allocation2 + $0x128] sm:$0xff]  ;;  %v722_v23 = vld [vmem:[#allocation2 + $0x70] sm:$0xff] }
  0xea   :  { %v1025_v29 = vmul.f32 %v2381_v14, %v737_v12  ;;  %v1024_v58 = vmul.f32 %v2380_v20, %v736_v11 }
  0xeb   :  { %v1003_v30 = vmul.f32 %v2386_v25, %v715_v22  ;;  %v1002_v31 = vmul.f32 %v2385_v28, %v714_v21  ;;  %v2394_v34 = vpop.permute.xlu1 %2393  ;;  %2290 = vmatprep.mubr.msk.bf16.mxu0 %vm1076_vm1, %v1046_v24  ;;  %v723_v24 = vld [vmem:[#allocation2 + $0x78] sm:$0xff] }
  0xec   :  { %v1058_v6 = vpack.c.bf16 %v1025_v29, %v1024_v58  ;;  %v2396_v35 = vunpack.i.h.bf16 %v2394_v34  ;;  %v2395_v16 = vunpack.i.l.bf16 %v2394_v34  ;;  %v2389_v37 = vpop.permute.xlu0 %2388 }
  0xed   :  { %v1047_v38 = vpack.c.bf16 %v1003_v30, %v1002_v31  ;;  %v2391_v40 = vunpack.i.h.bf16 %v2389_v37  ;;  %v2390_v41 = vunpack.i.l.bf16 %v2389_v37  ;;  %v746_v30 = vld [vmem:[#allocation2 + $0x130] sm:$0xff]  ;;  %v747_v31 = vld [vmem:[#allocation2 + $0x138] sm:$0xff]  ;;  %v724_v37 = vld [vmem:[#allocation2 + $0x80] sm:$0xff] }
  0xee   :  { %v1027_v17 = vmul.f32 %v2396_v35, %v739_v33  ;;  %v1026_v42 = vmul.f32 %v2395_v16, %v738_v32  ;;  %2314 = vmatprep.mubr.msk.bf16.mxu1 %vm1076_vm1, %v1058_v6 }
  0xef   :  { %v1005_v8 = vmul.f32 %v2391_v40, %v717_v36  ;;  %v1004_v43 = vmul.f32 %v2390_v41, %v716_v26  ;;  %2291 = vmatmul.mubr.msk.bf16.gmra.mrb[4].mxu0 %vm1076_vm1, %v1047_v38  ;;  %v725_v38 = vld [vmem:[#allocation2 + $0x88] sm:$0xff] }
  0xf0   :  { %v1059_v44 = vpack.c.bf16 %v1027_v17, %v1026_v42  ;;  %v2399_v46 = vpop.permute.xlu1 %2398  ;;  %v2404_v48 = vpop.permute.xlu0 %2403 }
  0xf1   :  { %v1048_v4 = vpack.c.bf16 %v1005_v8, %v1004_v43  ;;  %v2401_v49 = vunpack.i.h.bf16 %v2399_v46  ;;  %v2400_v50 = vunpack.i.l.bf16 %v2399_v46  ;;  %v2406_v51 = vunpack.i.h.bf16 %v2404_v48 }
  0xf2   :  { %v2405_v52 = vunpack.i.l.bf16 %v2404_v48  ;;  %2315 = vmatmul.mubr.msk.bf16.gmra.mrb[4].mxu1 %vm1076_vm1, %v1059_v44  ;;  %v748_v48 = vld [vmem:[#allocation2 + $0x140] sm:$0xff] }
  0xf3   :  { %v1029_v53 = vmul.f32 %v2401_v49, %v741_v45  ;;  %v1028_v54 = vmul.f32 %v2400_v50, %v740_v27  ;;  %v1007_v55 = vmul.f32 %v2406_v51, %v719_v47  ;;  %2294 = vmatprep.mubr.msk.bf16.mxu0 %vm1076_vm1, %v1048_v4  ;;  %v726_v27 = vld [vmem:[#allocation2 + $0x90] sm:$0xff]  ;;  %v727_v45 = vld [vmem:[#allocation2 + $0x98] sm:$0xff]  ;;  %v749_v4 = vld [vmem:[#allocation2 + $0x148] sm:$0xff] }
  0xf4   :  { %v1006_v56 = vmul.f32 %v2405_v52, %v718_v39  ;;  %v2409_v60 = vpop.permute.xlu1 %2408 }
  0xf5   :  { %v1060_v61 = vpack.c.bf16 %v1029_v53, %v1028_v54  ;;  %v2411_v10 = vunpack.i.h.bf16 %v2409_v60  ;;  %v2410_v18 = vunpack.i.l.bf16 %v2409_v60  ;;  %v751_v60 = vld [vmem:[#allocation2 + $0x158] sm:$0xff] }
  0xf6   :  { %v1049_v62 = vpack.c.bf16 %v1007_v55, %v1006_v56 }
  0xf7   :  { %v1031_v63 = vmul.f32 %v2411_v10, %v743_v59  ;;  %v1030_v15 = vmul.f32 %v2410_v18, %v742_v57  ;;  %2318 = vmatprep.mubr.msk.bf16.mxu1 %vm1076_vm1, %v1060_v61  ;;  %v750_v59 = vld [vmem:[#allocation2 + $0x150] sm:$0xff]  ;;  %v729_v10 = vld [vmem:[#allocation2 + $0xa8] sm:$0xff] }
  0xf8   :  { %2295 = vmatmul.mubr.msk.bf16.gmra.mrb[8].mxu0 %vm1076_vm1, %v1049_v62  ;;  %v2414_v2 = vpop.permute.xlu0 %2413 }
  0xf9   :  { %v1061_v19 = vpack.c.bf16 %v1031_v63, %v1030_v15  ;;  %v2416_v3 = vunpack.i.h.bf16 %v2414_v2  ;;  %v2415_v5 = vunpack.i.l.bf16 %v2414_v2 }
  0xfa   :  { %v2419_v11 = vpop.permute.xlu1 %2418 }
  0xfb   :  { %v2421_v12 = vunpack.i.h.bf16 %v2419_v11  ;;  %v2420_v13 = vunpack.i.l.bf16 %v2419_v11  ;;  %2319 = vmatmul.mubr.msk.bf16.gmra.mrb[8].mxu1 %vm1076_vm1, %v1061_v19  ;;  %v1009_v14 = vmul.f32 %v2416_v3, %v721_v1  ;;  %v1008_v20 = vmul.f32 %v2415_v5, %v720_v0  ;;  %v728_v19 = vld [vmem:[#allocation2 + $0xa0] sm:$0xff]  ;;  %v731_v11 = vld [vmem:[#allocation2 + $0xb8] sm:$0xff] }
  0xfc   :  { %v2424_v25 = vpop.permute.xlu0 %2423 }
  0xfd   :  { %v1033_v21 = vmul.f32 %v2421_v12, %v745_v9  ;;  %v1032_v22 = vmul.f32 %v2420_v13, %v744_v7  ;;  %v1050_v28 = vpack.c.bf16 %v1009_v14, %v1008_v20  ;;  %v2426_v29 = vunpack.i.h.bf16 %v2424_v25  ;;  %v730_v9 = vld [vmem:[#allocation2 + $0xb0] sm:$0xff] }
  0xfe   :  { %v2425_v58 = vunpack.i.l.bf16 %v2424_v25  ;;  %v2429_v32 = vpop.permute.xlu1 %2428 }
  0xff   :  { %v1062_v33 = vpack.c.bf16 %v1033_v21, %v1032_v22  ;;  %v2431_v34 = vunpack.i.h.bf16 %v2429_v32  ;;  %v2430_v6 = vunpack.i.l.bf16 %v2429_v32  ;;  %v1011_v35 = vmul.f32 %v2426_v29, %v723_v24  ;;  %2298 = vmatprep.mubr.msk.bf16.mxu0 %vm1076_vm1, %v1050_v28  ;;  %v752_v22 = vld [vmem:[#allocation2 + $0x160] sm:$0xff] }
 0x100   :  { %v1010_v16 = vmul.f32 %v2425_v58, %v722_v23  ;;  %v2434_v40 = vpop.permute.xlu0 %2433  ;;  %v753_v23 = vld [vmem:[#allocation2 + $0x168] sm:$0xff] }
 0x101   :  { %v1035_v26 = vmul.f32 %v2431_v34, %v747_v31  ;;  %v1034_v36 = vmul.f32 %v2430_v6, %v746_v30  ;;  %2322 = vmatprep.mubr.msk.bf16.mxu1 %vm1076_vm1, %v1062_v33  ;;  %v2436_v17 = vunpack.i.h.bf16 %v2434_v40  ;;  %v2435_v42 = vunpack.i.l.bf16 %v2434_v40  ;;  %v754_v33 = vld [vmem:[#allocation2 + $0x170] sm:$0xff]  ;;  %v755_v34 = vld [vmem:[#allocation2 + $0x178] sm:$0xff] }
 0x102   :  { %v1051_v41 = vpack.c.bf16 %v1011_v35, %v1010_v16  ;;  %v2948_v40 = vld [vmem:[#allocation8] ss:$0 sm:$0xff] }
 0x103   :  { %v1063_v8 = vpack.c.bf16 %v1035_v26, %v1034_v36  ;;  %v1013_v43 = vmul.f32 %v2436_v17, %v725_v38  ;;  %v1012_v44 = vmul.f32 %v2435_v42, %v724_v37 }
 0x104   :  { %2299 = vmatmul.mubr.msk.bf16.gmra.mrb[12].mxu0 %vm1076_vm1, %v1051_v41  ;;  %v2444_v46 = vpop.permute.xlu0 %2443 }
 0x105   :  { %2323 = vmatmul.mubr.msk.bf16.gmra.mrb[12].mxu1 %vm1076_vm1, %v1063_v8  ;;  %v1052_v47 = vpack.c.bf16 %v1013_v43, %v1012_v44  ;;  %v2446_v50 = vunpack.i.h.bf16 %v2444_v46  ;;  %v2445_v39 = vunpack.i.l.bf16 %v2444_v46 }
 0x106   :  { %v2439_v49 = vpop.permute.xlu1 %2438 }
 0x107   :  { %v2441_v51 = vunpack.i.h.bf16 %v2439_v49  ;;  %v2440_v52 = vunpack.i.l.bf16 %v2439_v49  ;;  %v1015_v53 = vmul.f32 %v2446_v50, %v727_v45  ;;  %v1014_v54 = vmul.f32 %v2445_v39, %v726_v27  ;;  %2302 = vmatprep.mubr.msk.bf16.mxu0 %vm1076_vm1, %v1052_v47 }
 0x109   :  { %v1037_v55 = vmul.f32 %v2441_v51, %v749_v4  ;;  %v1036_v56 = vmul.f32 %v2440_v52, %v748_v48  ;;  %v1053_v57 = vpack.c.bf16 %v1015_v53, %v1014_v54 }
 0x10a   :  { %v2449_v61 = vpop.permute.xlu1 %2448  ;;  %v2454_v18 = vpop.permute.xlu0 %2453 }
 0x10b   :  { %v1064_v62 = vpack.c.bf16 %v1037_v55, %v1036_v56  ;;  %v2451_v63 = vunpack.i.h.bf16 %v2449_v61  ;;  %v2450_v15 = vunpack.i.l.bf16 %v2449_v61  ;;  %v2456_v0 = vunpack.i.h.bf16 %v2454_v18 }
 0x10c   :  { %v2455_v1 = vunpack.i.l.bf16 %v2454_v18  ;;  %2303 = vmatmul.mubr.msk.bf16.gmra.mrb[16].mxu0 %vm1076_vm1, %v1053_v57 }
 0x10d   :  { %v1039_v2 = vmul.f32 %v2451_v63, %v751_v60  ;;  %v1038_v3 = vmul.f32 %v2450_v15, %v750_v59  ;;  %v1017_v5 = vmul.f32 %v2456_v0, %v729_v10  ;;  %2326 = vmatprep.mubr.msk.bf16.mxu1 %vm1076_vm1, %v1064_v62 }
 0x10e   :  { %v1016_v7 = vmul.f32 %v2455_v1, %v728_v19  ;;  %v2464_v12 = vpop.permute.xlu0 %2463 }
 0x10f   :  { %v1065_v13 = vpack.c.bf16 %v1039_v2, %v1038_v3  ;;  %v2466_v14 = vunpack.i.h.bf16 %v2464_v12  ;;  %v2465_v20 = vunpack.i.l.bf16 %v2464_v12 }
 0x110   :  { %v1054_v21 = vpack.c.bf16 %v1017_v5, %v1016_v7  ;;  %v2459_v24 = vpop.permute.xlu1 %2458 }
 0x111   :  { %v1019_v25 = vmul.f32 %v2466_v14, %v731_v11  ;;  %v1018_v28 = vmul.f32 %v2465_v20, %v730_v9  ;;  %2327 = vmatmul.mubr.msk.bf16.gmra.mrb[16].mxu1 %vm1076_vm1, %v1065_v13  ;;  %v2461_v29 = vunpack.i.h.bf16 %v2459_v24  ;;  %v2460_v58 = vunpack.i.l.bf16 %v2459_v24 }
 0x112   :  { %2306 = vmatprep.mubr.msk.bf16.mxu0 %vm1076_vm1, %v1054_v21 }
 0x113   :  { %v1055_v30 = vpack.c.bf16 %v1019_v25, %v1018_v28  ;;  %v1041_v31 = vmul.f32 %v2461_v29, %v753_v23  ;;  %v1040_v32 = vmul.f32 %v2460_v58, %v752_v22 }
 0x114   :  { %v2469_v6 = vpop.permute.xlu1 %2468 }
 0x115   :  { %2307 = vmatmul.mubr.msk.bf16.gmra.mrb[20].mxu0 %vm1076_vm1, %v1055_v30  ;;  %v1066_v35 = vpack.c.bf16 %v1041_v31, %v1040_v32  ;;  %v2471_v16 = vunpack.i.h.bf16 %v2469_v6  ;;  %v2470_v26 = vunpack.i.l.bf16 %v2469_v6 }
 0x117   :  { %v1043_v36 = vmul.f32 %v2471_v16, %v755_v34  ;;  %v1042_v37 = vmul.f32 %v2470_v26, %v754_v33  ;;  %2330 = vmatprep.mubr.msk.bf16.mxu1 %vm1076_vm1, %v1066_v35 }
 0x119   :  { %v1067_v38 = vpack.c.bf16 %v1043_v36, %v1042_v37 }
 0x11b   :  { %2331 = vmatmul.mubr.msk.bf16.gmra.mrb[20].mxu1 %vm1076_vm1, %v1067_v38 }
 0x1b8   :  { %v2288_v41 = vpop.f32.mrb[0].mxu0 }
 0x1b9   :  { %v1196_v17 = vadd.f32 %v2288_v41, %v2948_v40  ;;  %v1187_v42 = vpop.f32.mrb[1].mxu0 }
 0x1ba   :  { %v1188_v8 = vadd.f32 %v2948_v40, %v1187_v42  ;;  %v2289_v43 = vpop.f32.mrb[2].mxu0 }
 0x1bb   :  { %v1380_v44 = vmax.f32 %v1196_v17, 0.0  ;;  %v1199_v27 = vadd.f32 %v2289_v43, %v2948_v40  ;;  %v1190_v45 = vpop.f32.mrb[3].mxu0 }
 0x1bc   :  { %v1378_v46 = vmax.f32 %v1188_v8, 0.0  ;;  %v1191_v47 = vadd.f32 %v2948_v40, %v1190_v45  ;;  %v2312_v48 = vpop.f32.mrb[0].mxu1 }
 0x1bd   :  { %v1441_v4 = vsel %vm1426_vm2, %v1380_v44, -inf  ;;  %v1381_v49 = vmax.f32 %v1199_v27, 0.0  ;;  %v1292_v50 = vadd.f32 %v2312_v48, %v2948_v40  ;;  %v1283_v39 = vpop.f32.mrb[1].mxu1 }
 0x1be   :  { %v1442_v51 = vrot.slane %v1441_v4, 4  ;;  %v1427_v52 = vsel %vm1426_vm2, %v1378_v46, -inf  ;;  %v1379_v53 = vmax.f32 %v1191_v47, 0.0  ;;  %v1284_v54 = vadd.f32 %v2948_v40, %v1283_v39  ;;  %v2313_v55 = vpop.f32.mrb[2].mxu1 }
 0x1bf   :  { %v1428_v56 = vrot.slane %v1427_v52, 4  ;;  %v1448_v57 = vsel %vm1426_vm2, %v1381_v49, -inf  ;;  %v1404_v59 = vmax.f32 %v1292_v50, 0.0  ;;  %v1295_v60 = vadd.f32 %v2313_v55, %v2948_v40  ;;  %v1286_v61 = vpop.f32.mrb[3].mxu1 }
 0x1c0   :  { %v1443_v10 = vmax.f32 %v1441_v4, %v1442_v51  ;;  %v1449_v18 = vrot.slane %v1448_v57, 4  ;;  %v1434_v62 = vsel %vm1426_vm2, %v1379_v53, -inf  ;;  %v1402_v63 = vmax.f32 %v1284_v54, 0.0 }
 0x1c1   :  { %v1429_v15 = vmax.f32 %v1427_v52, %v1428_v56  ;;  %v1435_v19 = vrot.slane %v1434_v62, 4  ;;  %v1609_v0 = vsel %vm1426_vm2, %v1404_v59, -inf  ;;  %v1405_v1 = vmax.f32 %v1295_v60, 0.0 }
 0x1c2   :  { %v1444_v2 = vrot.slane %v1443_v10, 2  ;;  %v1450_v3 = vmax.f32 %v1448_v57, %v1449_v18  ;;  %v1610_v5 = vrot.slane %v1609_v0, 4  ;;  %v1595_v7 = vsel %vm1426_vm2, %v1402_v63, -inf  ;;  %v2292_v9 = vpop.f32.mrb[4].mxu0 }
 0x1c3   :  { %v1430_v11 = vrot.slane %v1429_v15, 2  ;;  %v1436_v12 = vmax.f32 %v1434_v62, %v1435_v19  ;;  %v1596_v13 = vrot.slane %v1595_v7, 4  ;;  %v1616_v14 = vsel %vm1426_vm2, %v1405_v1, -inf  ;;  %v1203_v20 = vpop.f32.mrb[5].mxu0 }
 0x1c4   :  { %v1445_v21 = vmax.f32 %v1443_v10, %v1444_v2  ;;  %v1451_v22 = vrot.slane %v1450_v3, 2  ;;  %v1611_v23 = vmax.f32 %v1609_v0, %v1610_v5  ;;  %v1617_v24 = vrot.slane %v1616_v14, 4  ;;  %v2293_v25 = vpop.f32.mrb[6].mxu0 }
 0x1c5   :  { %v1431_v28 = vmax.f32 %v1429_v15, %v1430_v11  ;;  %v1437_v29 = vrot.slane %v1436_v12, 2  ;;  %v1597_v58 = vmax.f32 %v1595_v7, %v1596_v13  ;;  %v1287_v30 = vadd.f32 %v2948_v40, %v1286_v61  ;;  %v2965_v31 = vpop.f32.mrb[4].mxu1  ;;  %v2967_v32 = vpop.f32.mrb[7].mxu0 }
 0x1c6   :  { %v1446_v33 = vrot.slane %v1445_v21, 1  ;;  %v1452_v34 = vmax.f32 %v1450_v3, %v1451_v22  ;;  %v1612_v6 = vrot.slane %v1611_v23, 2  ;;  %v1618_v35 = vmax.f32 %v1616_v14, %v1617_v24  ;;  %v2969_v16 = vpop.f32.mrb[5].mxu1 }
 0x1c7   :  { %v1432_v26 = vrot.slane %v1431_v28, 1  ;;  %v1438_v36 = vmax.f32 %v1436_v12, %v1437_v29  ;;  %v1598_v37 = vrot.slane %v1597_v58, 2  ;;  %v1403_v38 = vmax.f32 %v1287_v30, 0.0  ;;  %v2971_v41 = vpop.f32.mrb[6].mxu1 }
 0x1c8   :  { %v1447_v17 = vmax.f32 %v1445_v21, %v1446_v33  ;;  %v1453_v42 = vrot.slane %v1452_v34, 1  ;;  %v1613_v8 = vmax.f32 %v1611_v23, %v1612_v6  ;;  %v1619_v43 = vrot.slane %v1618_v35, 2  ;;  %v2973_v44 = vpop.f32.mrb[7].mxu1 }
 0x1c9   :  { %v1433_v27 = vmax.f32 %v1431_v28, %v1432_v26  ;;  %v1439_v45 = vrot.slane %v1438_v36, 1  ;;  %v1599_v46 = vmax.f32 %v1597_v58, %v1598_v37  ;;  %v1602_v47 = vsel %vm1426_vm2, %v1403_v38, -inf }
 0x1ca   :  { %v2213_v48 = vpack.c.bf16 %v1447_v17, %v1447_v17  ;;  %v1454_v4 = vmax.f32 %v1452_v34, %v1453_v42  ;;  %v1614_v49 = vrot.slane %v1613_v8, 1  ;;  %v1620_v50 = vmax.f32 %v1618_v35, %v1619_v43 }
 0x1cb   :  { %v2211_v39 = vpack.c.bf16 %v1433_v27, %v1433_v27  ;;  %v1440_v51 = vmax.f32 %v1438_v36, %v1439_v45  ;;  %v1600_v52 = vrot.slane %v1599_v46, 1  ;;  %v1603_v53 = vrot.slane %v1602_v47, 4  ;;  %v2976_v54 = vpop.f32.mrb[8].mxu0 }
 0x1cc   :  { %v1957_v55 = vunpack.c.l.b16 %v2213_v48  ;;  %v2214_v56 = vpack.c.bf16 %v1454_v4, %v1454_v4  ;;  %v1615_v57 = vmax.f32 %v1613_v8, %v1614_v49  ;;  %v1621_v59 = vrot.slane %v1620_v50, 1  ;;  %v2978_v60 = vpop.f32.mrb[9].mxu0 }
 0x1cd   :  { %v1955_v61 = vunpack.c.l.b16 %v2211_v39  ;;  %v2212_v10 = vpack.c.bf16 %v1440_v51, %v1440_v51  ;;  %v1601_v18 = vmax.f32 %v1599_v46, %v1600_v52  ;;  %v1604_v62 = vmax.f32 %v1602_v47, %v1603_v53  ;;  %v2980_v63 = vpop.f32.mrb[10].mxu0 }
 0x1ce   :  { %v1958_v15 = vunpack.c.l.b16 %v2214_v56  ;;  %v2237_v19 = vpack.c.bf16 %v1615_v57, %v1615_v57  ;;  %v1622_v0 = vmax.f32 %v1620_v50, %v1621_v59  ;;  %v1212_v1 = vadd.f32 %v2292_v9, %v2948_v40  ;;  %v2983_v2 = vpop.f32.mrb[8].mxu1  ;;  %v2985_v3 = vpop.f32.mrb[11].mxu0 }
 0x1cf   :  { %v1956_v5 = vunpack.c.l.b16 %v2212_v10  ;;  %v2235_v7 = vpack.c.bf16 %v1601_v18, %v1601_v18  ;;  %v1605_v11 = vrot.slane %v1604_v62, 2  ;;  %v1204_v12 = vadd.f32 %v2948_v40, %v1203_v20  ;;  %v2988_v13 = vpop.f32.mrb[9].mxu1 }
 0x1d0   :  { %v1981_v14 = vunpack.c.l.b16 %v2237_v19  ;;  %v2238_v21 = vpack.c.bf16 %v1622_v0, %v1622_v0  ;;  %v1384_v22 = vmax.f32 %v1212_v1, 0.0  ;;  %v1215_v23 = vadd.f32 %v2293_v25, %v2948_v40  ;;  %v2991_v24 = vpop.f32.mrb[10].mxu1 }
 0x1d1   :  { %v2004_v9 = vsel %vm2003_vm3, %v1956_v5, %v1955_v61  ;;  %v1979_v28 = vunpack.c.l.b16 %v2235_v7  ;;  %v1606_v29 = vmax.f32 %v1604_v62, %v1605_v11  ;;  %v1382_v58 = vmax.f32 %v1204_v12, 0.0  ;;  %v2994_v30 = vpop.f32.mrb[11].mxu1 }
 0x1d2   :  { %v2006_v33 = vsel %vm2005_vm4, %v1957_v55, %v2004_v9  ;;  %v1982_v34 = vunpack.c.l.b16 %v2238_v21  ;;  %v1469_v20 = vsel %vm1426_vm2, %v1384_v22, -inf  ;;  %v1385_v6 = vmax.f32 %v1215_v23, 0.0 }
 0x1d3   :  { %v1607_v35 = vrot.slane %v1606_v29, 1  ;;  %v1470_v26 = vrot.slane %v1469_v20, 4  ;;  %v1455_v36 = vsel %vm1426_vm2, %v1382_v58, -inf  ;;  %v3000_v25 = vsel %vm2007_vm5, %v1958_v15, %v2006_v33 }
 0x1d4   :  { %v1456_v37 = vrot.slane %v1455_v36, 4  ;;  %v1476_v38 = vsel %vm1426_vm2, %v1385_v6, -inf  ;;  %v1308_v17 = vadd.f32 %v2965_v31, %v2948_v40  ;;  %v1207_v42 = vadd.f32 %v2948_v40, %v2967_v32 }
 0x1d5   :  { %v1608_v8 = vmax.f32 %v1606_v29, %v1607_v35  ;;  %v1471_v43 = vmax.f32 %v1469_v20, %v1470_v26  ;;  %v1477_v27 = vrot.slane %v1476_v38, 4  ;;  %v1300_v45 = vadd.f32 %v2948_v40, %v2969_v16 }
 0x1d6   :  { %v1457_v46 = vmax.f32 %v1455_v36, %v1456_v37  ;;  %v1408_v47 = vmax.f32 %v1308_v17, 0.0  ;;  %v1383_v48 = vmax.f32 %v1207_v42, 0.0  ;;  %v1311_v4 = vadd.f32 %v2971_v41, %v2948_v40 }
 0x1d7   :  { %v2236_v49 = vpack.c.bf16 %v1608_v8, %v1608_v8  ;;  %v1472_v50 = vrot.slane %v1471_v43, 2  ;;  %v1478_v39 = vmax.f32 %v1476_v38, %v1477_v27  ;;  %v1406_v51 = vmax.f32 %v1300_v45, 0.0  ;;  %v3011_v31 = vpop.f32.mrb[12].mxu0 }
 0x1d8   :  { %v1458_v52 = vrot.slane %v1457_v46, 2  ;;  %v1637_v32 = vsel %vm1426_vm2, %v1408_v47, -inf  ;;  %v1462_v53 = vsel %vm1426_vm2, %v1383_v48, -inf  ;;  %v1409_v55 = vmax.f32 %v1311_v4, 0.0  ;;  %v3015_v56 = vpop.f32.mrb[13].mxu0  ;;  %v3017_v16 = vpop.f32.mrb[12].mxu1 }
 0x1d9   :  { %v1980_v57 = vunpack.c.l.b16 %v2236_v49  ;;  %v1473_v59 = vmax.f32 %v1471_v43, %v1472_v50  ;;  %v1479_v41 = vrot.slane %v1478_v39, 2  ;;  %v1638_v61 = vrot.slane %v1637_v32, 4  ;;  %v3019_v10 = vpop.f32.mrb[14].mxu0  ;;  %v3021_v18 = vpop.f32.mrb[13].mxu1 }
 0x1da   :  { %v1459_v62 = vmax.f32 %v1457_v46, %v1458_v52  ;;  %v1463_v15 = vrot.slane %v1462_v53, 4  ;;  %v1623_v19 = vsel %vm1426_vm2, %v1406_v51, -inf  ;;  %v1644_v0 = vsel %vm1426_vm2, %v1409_v55, -inf  ;;  %v3025_v1 = vpop.f32.mrb[15].mxu0  ;;  %v3027_v5 = vpop.f32.mrb[14].mxu1 }
 0x1db   :  { %v2031_v7 = vsel %vm2003_vm3, %v1980_v57, %v1979_v28  ;;  %v1474_v11 = vrot.slane %v1473_v59, 1  ;;  %v1480_v12 = vmax.f32 %v1478_v39, %v1479_v41  ;;  %v1639_v21 = vmax.f32 %v1637_v32, %v1638_v61  ;;  %v3030_v22 = vpop.f32.mrb[15].mxu1 }
 0x1dc   :  { %v2032_v23 = vsel %vm2005_vm4, %v1981_v14, %v2031_v7  ;;  %v1460_v9 = vrot.slane %v1459_v62, 1  ;;  %v1464_v29 = vmax.f32 %v1462_v53, %v1463_v15  ;;  %v1624_v58 = vrot.slane %v1623_v19, 4 }
 0x1dd   :  { %v1475_v33 = vmax.f32 %v1473_v59, %v1474_v11  ;;  %v1481_v20 = vrot.slane %v1480_v12, 1  ;;  %v1640_v6 = vrot.slane %v1639_v21, 2  ;;  %v3034_v35 = vsel %vm2007_vm5, %v1982_v34, %v2032_v23 }
 0x1de   :  { %v1461_v26 = vmax.f32 %v1459_v62, %v1460_v9  ;;  %v1465_v36 = vrot.slane %v1464_v29, 2  ;;  %v1625_v37 = vmax.f32 %v1623_v19, %v1624_v58  ;;  %v1645_v28 = vrot.slane %v1644_v0, 4 }
 0x1df   :  { %v2217_v38 = vpack.c.bf16 %v1475_v33, %v1475_v33  ;;  %v1482_v17 = vmax.f32 %v1480_v12, %v1481_v20  ;;  %v1641_v42 = vmax.f32 %v1639_v21, %v1640_v6  ;;  %v1303_v14 = vadd.f32 %v2948_v40, %v2973_v44  ;;  %v3038_v8 = vpop.f32.mrb[16].mxu0 }
 0x1e0   :  { %v2215_v43 = vpack.c.bf16 %v1461_v26, %v1461_v26  ;;  %v1466_v27 = vmax.f32 %v1464_v29, %v1465_v36  ;;  %v1626_v45 = vrot.slane %v1625_v37, 2  ;;  %v1646_v46 = vmax.f32 %v1644_v0, %v1645_v28  ;;  %v3040_v34 = vpop.f32.mrb[17].mxu0 }
 0x1e1   :  { %v1961_v47 = vunpack.c.l.b16 %v2217_v38  ;;  %v2218_v48 = vpack.c.bf16 %v1482_v17, %v1482_v17  ;;  %v1642_v4 = vrot.slane %v1641_v42, 1  ;;  %v1407_v49 = vmax.f32 %v1303_v14, 0.0  ;;  %v3042_v50 = vpop.f32.mrb[18].mxu0 }
 0x1e2   :  { %v1959_v39 = vunpack.c.l.b16 %v2215_v43  ;;  %v1467_v51 = vrot.slane %v1466_v27, 1  ;;  %v1627_v52 = vmax.f32 %v1625_v37, %v1626_v45  ;;  %v1647_v44 = vrot.slane %v1646_v46, 2  ;;  %v3044_v32 = vpop.f32.mrb[19].mxu0 }
 0x1e3   :  { %v1962_v53 = vunpack.c.l.b16 %v2218_v48  ;;  %v1643_v55 = vmax.f32 %v1641_v42, %v1642_v4  ;;  %v1630_v57 = vsel %vm1426_vm2, %v1407_v49, -inf  ;;  %v1228_v59 = vadd.f32 %v2976_v54, %v2948_v40 }
 0x1e4   :  { %v2010_v41 = vsel %vm2009_vm6, %v1959_v39, %v3000_v25  ;;  %v1468_v61 = vmax.f32 %v1466_v27, %v1467_v51  ;;  %v1628_v62 = vrot.slane %v1627_v52, 1  ;;  %v1648_v15 = vmax.f32 %v1646_v46, %v1647_v44  ;;  %v3051_v19 = vpop.f32.mrb[16].mxu1 }
 0x1e5   :  { %v2241_v0 = vpack.c.bf16 %v1643_v55, %v1643_v55  ;;  %v1631_v7 = vrot.slane %v1630_v57, 4  ;;  %v1388_v11 = vmax.f32 %v1228_v59, 0.0  ;;  %v1220_v12 = vadd.f32 %v2948_v40, %v2978_v60  ;;  %v3055_v21 = vpop.f32.mrb[17].mxu1 }
 0x1e6   :  { %v2216_v23 = vpack.c.bf16 %v1468_v61, %v1468_v61  ;;  %v1629_v9 = vmax.f32 %v1627_v52, %v1628_v62  ;;  %v1649_v54 = vrot.slane %v1648_v15, 1  ;;  %v1231_v25 = vadd.f32 %v2980_v63, %v2948_v40  ;;  %v3059_v29 = vpop.f32.mrb[18].mxu1 }
 0x1e7   :  { %v3061_v58 = vunpack.c.l.b16 %v2241_v0  ;;  %v1632_v33 = vmax.f32 %v1630_v57, %v1631_v7  ;;  %v1497_v20 = vsel %vm1426_vm2, %v1388_v11, -inf  ;;  %v1386_v6 = vmax.f32 %v1220_v12, 0.0  ;;  %v3064_v26 = vpop.f32.mrb[19].mxu1 }
 0x1e8   :  { %v1960_v36 = vunpack.c.l.b16 %v2216_v23  ;;  %v2239_v60 = vpack.c.bf16 %v1629_v9, %v1629_v9  ;;  %v1650_v37 = vmax.f32 %v1648_v15, %v1649_v54  ;;  %v1498_v28 = vrot.slane %v1497_v20, 4  ;;  %v3066_v38 = vpop.f32.mrb[20].mxu0 }
 0x1e9   :  { %v1633_v17 = vrot.slane %v1632_v33, 2  ;;  %v1483_v42 = vsel %vm1426_vm2, %v1386_v6, -inf  ;;  %v1389_v63 = vmax.f32 %v1231_v25, 0.0  ;;  %v1324_v14 = vadd.f32 %v2983_v2, %v2948_v40  ;;  %v3071_v43 = vpop.f32.mrb[21].mxu0 }
 0x1ea   :  { %v2012_v27 = vsel %vm2011_vm7, %v1960_v36, %v2010_v41  ;;  %v1983_v45 = vunpack.c.l.b16 %v2239_v60  ;;  %v2242_v46 = vpack.c.bf16 %v1650_v37, %v1650_v37  ;;  %v1499_v48 = vmax.f32 %v1497_v20, %v1498_v28  ;;  %v3074_v4 = vpop.f32.mrb[22].mxu0 }
 0x1eb   :  { %v2014_v49 = vsel %vm2013_vm9, %v1961_v47, %v2012_v27  ;;  %v1634_v39 = vmax.f32 %v1632_v33, %v1633_v17  ;;  %v1484_v51 = vrot.slane %v1483_v42, 4  ;;  %v1504_v52 = vsel %vm1426_vm2, %v1389_v63, -inf  ;;  %v3078_v44 = vpop.f32.mrb[23].mxu0 }
 0x1ec   :  { %v2016_v55 = vsel %vm2015_vm10, %v1962_v53, %v2014_v49  ;;  %v2034_v2 = vsel %vm2009_vm6, %v1983_v45, %v3034_v35  ;;  %v1986_v57 = vunpack.c.l.b16 %v2242_v46  ;;  %v1500_v59 = vrot.slane %v1499_v48, 2 }
 0x1ed   :  { %v2052_v41 = vpack.c.b16 %v2016_v55, %v2016_v55  ;;  %v1635_v61 = vrot.slane %v1634_v39, 1  ;;  %v1485_v62 = vmax.f32 %v1483_v42, %v1484_v51  ;;  %v1505_v15 = vrot.slane %v1504_v52, 4 }
 0x1ee   :  { %v1501_v0 = vmax.f32 %v1499_v48, %v1500_v59  ;;  %v1412_v7 = vmax.f32 %v1324_v14, 0.0  ;;  %v1223_v47 = vadd.f32 %v2948_v40, %v2985_v3  ;;  %v1316_v11 = vadd.f32 %v2948_v40, %v2988_v13  ;;  %v3090_v9 = vpop.f32.mrb[20].mxu1 }
 0x1ef   :  { %2065 = vst.msk [vmem:[#allocation10] sm:$0xf] %vm2064_vm11, %v2052_v41  ;;  %v1636_v53 = vmax.f32 %v1634_v39, %v1635_v61  ;;  %v1486_v12 = vrot.slane %v1485_v62, 2  ;;  %v1506_v23 = vmax.f32 %v1504_v52, %v1505_v15  ;;  %v1327_v35 = vadd.f32 %v2991_v24, %v2948_v40  ;;  %v3093_v6 = vpop.f32.mrb[21].mxu1 }
 0x1f0   :  { %v1502_v54 = vrot.slane %v1501_v0, 1  ;;  %v1665_v25 = vsel %vm1426_vm2, %v1412_v7, -inf  ;;  %v1387_v33 = vmax.f32 %v1223_v47, 0.0  ;;  %v1410_v20 = vmax.f32 %v1316_v11, 0.0  ;;  %v3095_v37 = vpop.f32.mrb[22].mxu1 }
 0x1f1   :  { %v2240_v3 = vpack.c.bf16 %v1636_v53, %v1636_v53  ;;  %v1487_v36 = vmax.f32 %v1485_v62, %v1486_v12  ;;  %v1507_v13 = vrot.slane %v1506_v23, 2  ;;  %v1666_v60 = vrot.slane %v1665_v25, 4  ;;  %v3099_v63 = vpop.f32.mrb[23].mxu1 }
 0x1f2   :  { %v1503_v28 = vmax.f32 %v1501_v0, %v1502_v54  ;;  %v1490_v17 = vsel %vm1426_vm2, %v1387_v33, -inf  ;;  %v1651_v24 = vsel %vm1426_vm2, %v1410_v20, -inf  ;;  %v1413_v42 = vmax.f32 %v1327_v35, 0.0 }
 0x1f3   :  { %v1984_v14 = vunpack.c.l.b16 %v2240_v3  ;;  %v1488_v27 = vrot.slane %v1487_v36, 1  ;;  %v1508_v45 = vmax.f32 %v1506_v23, %v1507_v13  ;;  %v1667_v46 = vmax.f32 %v1665_v25, %v1666_v60 }
 0x1f4   :  { %v2221_v48 = vpack.c.bf16 %v1503_v28, %v1503_v28  ;;  %v1491_v49 = vrot.slane %v1490_v17, 4  ;;  %v1652_v39 = vrot.slane %v1651_v24, 4  ;;  %v1672_v51 = vsel %vm1426_vm2, %v1413_v42, -inf }
 0x1f5   :  { %v2035_v52 = vsel %vm2011_vm7, %v1984_v14, %v2034_v2  ;;  %v1489_v55 = vmax.f32 %v1487_v36, %v1488_v27  ;;  %v1509_v59 = vrot.slane %v1508_v45, 1  ;;  %v1668_v41 = vrot.slane %v1667_v46, 2 }
 0x1f6   :  { %v2036_v61 = vsel %vm2013_vm9, %v3061_v58, %v2035_v52  ;;  %v1492_v62 = vmax.f32 %v1490_v17, %v1491_v49  ;;  %v1653_v15 = vmax.f32 %v1651_v24, %v1652_v39  ;;  %v1673_v23 = vrot.slane %v1672_v51, 4 }
 0x1f7   :  { %v2037_v0 = vsel %vm2015_vm10, %v1986_v57, %v2036_v61  ;;  %v1510_v7 = vmax.f32 %v1508_v45, %v1509_v59  ;;  %v1669_v47 = vmax.f32 %v1667_v46, %v1668_v41  ;;  %v1965_v35 = vunpack.c.l.b16 %v2221_v48 }
 0x1f8   :  { %v2055_v11 = vpack.c.b16 %v2037_v0, %v2037_v0  ;;  %v1493_v53 = vrot.slane %v1492_v62, 2  ;;  %v1654_v12 = vrot.slane %v1653_v15, 2  ;;  %v2219_v54 = vpack.c.bf16 %v1489_v55, %v1489_v55 }
 0x1f9   :  { %v1670_v25 = vrot.slane %v1669_v47, 1  ;;  %v1319_v2 = vadd.f32 %v2948_v40, %v2994_v30  ;;  %v1674_v20 = vmax.f32 %v1672_v51, %v1673_v23  ;;  %v1244_v57 = vadd.f32 %v3011_v31, %v2948_v40 }
 0x1fa   :  { %2068 = vst.msk [vmem:[#allocation10 + $0xc] sm:$0xf] %vm2064_vm11, %v2055_v11  ;;  %v1494_v33 = vmax.f32 %v1492_v62, %v1493_v53  ;;  %v1655_v58 = vmax.f32 %v1653_v15, %v1654_v12  ;;  %v2222_v3 = vpack.c.bf16 %v1510_v7, %v1510_v7  ;;  %v1236_v60 = vadd.f32 %v2948_v40, %v3015_v56 }
 0x1fb   :  { %v1671_v36 = vmax.f32 %v1669_v47, %v1670_v25  ;;  %v1411_v13 = vmax.f32 %v1319_v2, 0.0  ;;  %v1675_v24 = vrot.slane %v1674_v20, 2  ;;  %v1392_v42 = vmax.f32 %v1244_v57, 0.0 }
 0x1fc   :  { %v1495_v28 = vrot.slane %v1494_v33, 1  ;;  %v1656_v17 = vrot.slane %v1655_v58, 1  ;;  %v1963_v14 = vunpack.c.l.b16 %v2219_v54  ;;  %v1390_v27 = vmax.f32 %v1236_v60, 0.0 }
 0x1fd   :  { %v1658_v30 = vsel %vm1426_vm2, %v1411_v13, -inf  ;;  %v1247_v45 = vadd.f32 %v3019_v10, %v2948_v40  ;;  %v2245_v46 = vpack.c.bf16 %v1671_v36, %v1671_v36  ;;  %v1676_v31 = vmax.f32 %v1674_v20, %v1675_v24 }
 0x1fe   :  { %v1496_v48 = vmax.f32 %v1494_v33, %v1495_v28  ;;  %v1659_v49 = vrot.slane %v1658_v30, 4  ;;  %v1966_v39 = vunpack.c.l.b16 %v2222_v3  ;;  %v1525_v51 = vsel %vm1426_vm2, %v1392_v42, -inf }
 0x1ff   :  { %v1511_v56 = vsel %vm1426_vm2, %v1390_v27, -inf  ;;  %v1393_v52 = vmax.f32 %v1247_v45, 0.0  ;;  %v1657_v59 = vmax.f32 %v1655_v58, %v1656_v17  ;;  %v1677_v41 = vrot.slane %v1676_v31, 1 }
 0x200   :  { %v2220_v55 = vpack.c.bf16 %v1496_v48, %v1496_v48  ;;  %v1660_v61 = vmax.f32 %v1658_v30, %v1659_v49  ;;  %v1526_v62 = vrot.slane %v1525_v51, 4  ;;  %v1512_v15 = vrot.slane %v1511_v56, 4 }
 0x201   :  { %v1532_v0 = vsel %vm1426_vm2, %v1393_v52, -inf  ;;  %v1340_v10 = vadd.f32 %v3017_v16, %v2948_v40  ;;  %v1989_v7 = vunpack.c.l.b16 %v2245_v46  ;;  %v1678_v11 = vmax.f32 %v1676_v31, %v1677_v41 }
 0x202   :  { %v1964_v47 = vunpack.c.l.b16 %v2220_v55  ;;  %v1661_v53 = vrot.slane %v1660_v61, 2  ;;  %v1527_v12 = vmax.f32 %v1525_v51, %v1526_v62  ;;  %v1513_v23 = vmax.f32 %v1511_v56, %v1512_v15 }
 0x203   :  { %v1533_v54 = vrot.slane %v1532_v0, 4  ;;  %v1416_v25 = vmax.f32 %v1340_v10, 0.0  ;;  %v2243_v33 = vpack.c.bf16 %v1657_v59, %v1657_v59  ;;  %v1239_v20 = vadd.f32 %v2948_v40, %v3025_v1 }
 0x204   :  { %v2017_v2 = vsel %vm2003_vm3, %v1964_v47, %v1963_v14  ;;  %v1662_v58 = vmax.f32 %v1660_v61, %v1661_v53  ;;  %v1528_v3 = vrot.slane %v1527_v12, 2  ;;  %v1514_v36 = vrot.slane %v1513_v23, 2 }
 0x205   :  { %v2018_v57 = vsel %vm2005_vm4, %v1965_v35, %v2017_v2  ;;  %v1534_v16 = vmax.f32 %v1532_v0, %v1533_v54  ;;  %v2246_v13 = vpack.c.bf16 %v1678_v11, %v1678_v11  ;;  %v1693_v17 = vsel %vm1426_vm2, %v1416_v25, -inf }
 0x206   :  { %v1663_v60 = vrot.slane %v1662_v58, 1  ;;  %v2019_v28 = vsel %vm2007_vm5, %v1966_v39, %v2018_v57  ;;  %v1529_v24 = vmax.f32 %v1527_v12, %v1528_v3  ;;  %v1515_v42 = vmax.f32 %v1513_v23, %v1514_v36 }
 0x207   :  { %v1535_v30 = vrot.slane %v1534_v16, 2  ;;  %v1694_v14 = vrot.slane %v1693_v17, 4  ;;  %v1391_v45 = vmax.f32 %v1239_v20, 0.0  ;;  %v1332_v1 = vadd.f32 %v2948_v40, %v3021_v18 }
 0x208   :  { %v1664_v27 = vmax.f32 %v1662_v58, %v1663_v60  ;;  %v1343_v35 = vadd.f32 %v3027_v5, %v2948_v40  ;;  %v1530_v46 = vrot.slane %v1529_v24, 1  ;;  %v1516_v48 = vrot.slane %v1515_v42, 1 }
 0x209   :  { %v1536_v31 = vmax.f32 %v1534_v16, %v1535_v30  ;;  %v1695_v49 = vmax.f32 %v1693_v17, %v1694_v14  ;;  %v1518_v39 = vsel %vm1426_vm2, %v1391_v45, -inf  ;;  %v1414_v56 = vmax.f32 %v1332_v1, 0.0 }
 0x20a   :  { %v2244_v51 = vpack.c.bf16 %v1664_v27, %v1664_v27  ;;  %v1417_v52 = vmax.f32 %v1343_v35, 0.0  ;;  %v1987_v55 = vunpack.c.l.b16 %v2243_v33  ;;  %v1531_v59 = vmax.f32 %v1529_v24, %v1530_v46 }
 0x20b   :  { %v1517_v41 = vmax.f32 %v1515_v42, %v1516_v48  ;;  %v1537_v61 = vrot.slane %v1536_v31, 1  ;;  %v1519_v15 = vrot.slane %v1518_v39, 4  ;;  %v1679_v18 = vsel %vm1426_vm2, %v1414_v56, -inf }
 0x20c   :  { %v1988_v62 = vunpack.c.l.b16 %v2244_v51  ;;  %v1700_v0 = vsel %vm1426_vm2, %v1417_v52, -inf  ;;  %v1990_v5 = vunpack.c.l.b16 %v2246_v13  ;;  %v1696_v11 = vrot.slane %v1695_v49, 2 }
 0x20d   :  { %v2223_v10 = vpack.c.bf16 %v1517_v41, %v1517_v41  ;;  %v1538_v47 = vmax.f32 %v1536_v31, %v1537_v61  ;;  %v1520_v12 = vmax.f32 %v1518_v39, %v1519_v15  ;;  %v1680_v23 = vrot.slane %v1679_v18, 4 }
 0x20e   :  { %v2038_v53 = vsel %vm2003_vm3, %v1988_v62, %v1987_v55  ;;  %v1701_v54 = vrot.slane %v1700_v0, 4  ;;  %v2225_v33 = vpack.c.bf16 %v1531_v59, %v1531_v59  ;;  %v1697_v36 = vmax.f32 %v1695_v49, %v1696_v11 }
 0x20f   :  { %v2039_v25 = vsel %vm2005_vm4, %v1989_v7, %v2038_v53  ;;  %v1967_v2 = vunpack.c.l.b16 %v2223_v10  ;;  %v1521_v58 = vrot.slane %v1520_v12, 2  ;;  %v1681_v20 = vmax.f32 %v1679_v18, %v1680_v23 }
 0x210   :  { %v2040_v57 = vsel %vm2007_vm5, %v1990_v5, %v2039_v25  ;;  %v1702_v16 = vmax.f32 %v1700_v0, %v1701_v54  ;;  %v1335_v13 = vadd.f32 %v2948_v40, %v3030_v22  ;;  %v2226_v60 = vpack.c.bf16 %v1538_v47, %v1538_v47 }
 0x211   :  { %v2020_v3 = vsel %vm2009_vm6, %v1967_v2, %v2019_v28  ;;  %v1522_v17 = vmax.f32 %v1520_v12, %v1521_v58  ;;  %v1682_v24 = vrot.slane %v1681_v20, 2  ;;  %v1260_v42 = vadd.f32 %v3038_v8, %v2948_v40 }
 0x212   :  { %v1703_v7 = vrot.slane %v1702_v16, 2  ;;  %v1415_v30 = vmax.f32 %v1335_v13, 0.0  ;;  %v1252_v14 = vadd.f32 %v2948_v40, %v3040_v34  ;;  %v1263_v27 = vadd.f32 %v3042_v50, %v2948_v40 }
 0x213   :  { %v1969_v28 = vunpack.c.l.b16 %v2225_v33  ;;  %v1523_v45 = vrot.slane %v1522_v17, 1  ;;  %v1683_v1 = vmax.f32 %v1681_v20, %v1682_v24  ;;  %v1396_v35 = vmax.f32 %v1260_v42, 0.0 }
 0x214   :  { %v1704_v46 = vmax.f32 %v1702_v16, %v1703_v7  ;;  %v1686_v22 = vsel %vm1426_vm2, %v1415_v30, -inf  ;;  %v1394_v48 = vmax.f32 %v1252_v14, 0.0  ;;  %v1397_v31 = vmax.f32 %v1263_v27, 0.0 }
 0x215   :  { %v1698_v49 = vrot.slane %v1697_v36, 1  ;;  %v1524_v51 = vmax.f32 %v1522_v17, %v1523_v45  ;;  %v1684_v8 = vrot.slane %v1683_v1, 1  ;;  %v1687_v39 = vrot.slane %v1686_v22, 4 }
 0x216   :  { %v1970_v56 = vunpack.c.l.b16 %v2226_v60  ;;  %v1553_v52 = vsel %vm1426_vm2, %v1396_v35, -inf  ;;  %v1539_v34 = vsel %vm1426_vm2, %v1394_v48, -inf  ;;  %v1560_v50 = vsel %vm1426_vm2, %v1397_v31, -inf }
 0x217   :  { %v2224_v55 = vpack.c.bf16 %v1524_v51, %v1524_v51  ;;  %v1685_v59 = vmax.f32 %v1683_v1, %v1684_v8  ;;  %v1688_v41 = vmax.f32 %v1686_v22, %v1687_v39  ;;  %v1554_v61 = vrot.slane %v1553_v52, 4 }
 0x218   :  { %v1705_v62 = vrot.slane %v1704_v46, 1  ;;  %v1540_v15 = vrot.slane %v1539_v34, 4  ;;  %v1561_v18 = vrot.slane %v1560_v50, 4  ;;  %v1356_v0 = vadd.f32 %v3051_v19, %v2948_v40 }
 0x219   :  { %v1968_v5 = vunpack.c.l.b16 %v2224_v55  ;;  %v2247_v10 = vpack.c.bf16 %v1685_v59, %v1685_v59  ;;  %v1689_v47 = vrot.slane %v1688_v41, 2  ;;  %v1555_v11 = vmax.f32 %v1553_v52, %v1554_v61 }
 0x21a   :  { %v1699_v53 = vmax.f32 %v1697_v36, %v1698_v49  ;;  %v1541_v12 = vmax.f32 %v1539_v34, %v1540_v15  ;;  %v1562_v23 = vmax.f32 %v1560_v50, %v1561_v18  ;;  %v1420_v54 = vmax.f32 %v1356_v0, 0.0 }
 0x21b   :  { %v2021_v25 = vsel %vm2011_vm7, %v1968_v5, %v2020_v3  ;;  %v1991_v2 = vunpack.c.l.b16 %v2247_v10  ;;  %v1690_v33 = vmax.f32 %v1688_v41, %v1689_v47  ;;  %v1556_v58 = vrot.slane %v1555_v11, 2 }
 0x21c   :  { %v2022_v20 = vsel %vm2013_vm9, %v1969_v28, %v2021_v25  ;;  %v1706_v16 = vmax.f32 %v1704_v46, %v1705_v62  ;;  %v1542_v13 = vrot.slane %v1541_v12, 2  ;;  %v1563_v60 = vrot.slane %v1562_v23, 2 }
 0x21d   :  { %v2023_v19 = vsel %vm2015_vm10, %v1970_v56, %v2022_v20  ;;  %v2041_v17 = vsel %vm2009_vm6, %v1991_v2, %v2040_v57  ;;  %v1691_v24 = vrot.slane %v1690_v33, 1  ;;  %v1557_v42 = vmax.f32 %v1555_v11, %v1556_v58 }
 0x21e   :  { %v2053_v36 = vpack.c.b16 %v2023_v19, %v2023_v19  ;;  %v1543_v7 = vmax.f32 %v1541_v12, %v1542_v13  ;;  %v1564_v30 = vmax.f32 %v1562_v23, %v1563_v60  ;;  %v1721_v14 = vsel %vm1426_vm2, %v1420_v54, -inf }
 0x21f   :  { %v1692_v3 = vmax.f32 %v1690_v33, %v1691_v24  ;;  %v1722_v27 = vrot.slane %v1721_v14, 4  ;;  %v1255_v45 = vadd.f32 %v2948_v40, %v3044_v32  ;;  %v2249_v28 = vpack.c.bf16 %v1699_v53, %v1699_v53 }
 0x220   :  { %2066 = vst.msk [vmem:[#allocation10 + $0x4] sm:$0xf] %vm2064_vm11, %v2053_v36  ;;  %v1348_v1 = vadd.f32 %v2948_v40, %v3055_v21  ;;  %v1359_v57 = vadd.f32 %v3059_v29, %v2948_v40  ;;  %v2250_v35 = vpack.c.bf16 %v1706_v16, %v1706_v16  ;;  %v1558_v22 = vrot.slane %v1557_v42, 1 }
 0x221   :  { %v2248_v46 = vpack.c.bf16 %v1692_v3, %v1692_v3  ;;  %v1395_v48 = vmax.f32 %v1255_v45, 0.0  ;;  %v1544_v31 = vrot.slane %v1543_v7, 1  ;;  %v1565_v49 = vrot.slane %v1564_v30, 1 }
 0x222   :  { %v1418_v51 = vmax.f32 %v1348_v1, 0.0  ;;  %v1723_v39 = vmax.f32 %v1721_v14, %v1722_v27  ;;  %v1421_v56 = vmax.f32 %v1359_v57, 0.0  ;;  %v1993_v52 = vunpack.c.l.b16 %v2249_v28 }
 0x223   :  { %v1992_v8 = vunpack.c.l.b16 %v2248_v46  ;;  %v1546_v32 = vsel %vm1426_vm2, %v1395_v48, -inf  ;;  %v1994_v21 = vunpack.c.l.b16 %v2250_v35  ;;  %v1559_v29 = vmax.f32 %v1557_v42, %v1558_v22 }
 0x224   :  { %v1547_v34 = vrot.slane %v1546_v32, 4  ;;  %v1707_v50 = vsel %vm1426_vm2, %v1418_v51, -inf  ;;  %v1545_v61 = vmax.f32 %v1543_v7, %v1544_v31  ;;  %v1566_v62 = vmax.f32 %v1564_v30, %v1565_v49  ;;  %v2478_v51 = vld [vmem:[#allocation8] ss:$0 sm:$0xff] }
 0x225   :  { %v2042_v55 = vsel %vm2011_vm7, %v1992_v8, %v2041_v17  ;;  %v1708_v59 = vrot.slane %v1707_v50, 4  ;;  %v1724_v0 = vrot.slane %v1723_v39, 2  ;;  %v1728_v10 = vsel %vm1426_vm2, %v1421_v56, -inf }
 0x226   :  { %v2043_v41 = vsel %vm2013_vm9, %v1993_v52, %v2042_v55  ;;  %v1548_v15 = vmax.f32 %v1546_v32, %v1547_v34  ;;  %v1729_v53 = vrot.slane %v1728_v10, 4  ;;  %v1351_v12 = vadd.f32 %v2948_v40, %v3064_v26 }
 0x227   :  { %v2044_v18 = vsel %vm2015_vm10, %v1994_v21, %v2043_v41  ;;  %v1709_v5 = vmax.f32 %v1707_v50, %v1708_v59  ;;  %v2229_v23 = vpack.c.bf16 %v1559_v29, %v1559_v29  ;;  %v1276_v25 = vadd.f32 %v3066_v38, %v2948_v40 }
 0x228   :  { %v2056_v47 = vpack.c.b16 %v2044_v18, %v2044_v18  ;;  %v1549_v11 = vrot.slane %v1548_v15, 2  ;;  %v1268_v2 = vadd.f32 %v2948_v40, %v3071_v43  ;;  %v1730_v58 = vmax.f32 %v1728_v10, %v1729_v53 }
 0x229   :  { %v1710_v54 = vrot.slane %v1709_v5, 2  ;;  %v1419_v20 = vmax.f32 %v1351_v12, 0.0  ;;  %v1279_v16 = vadd.f32 %v3074_v4, %v2948_v40  ;;  %v1725_v13 = vmax.f32 %v1723_v39, %v1724_v0 }
 0x22a   :  { %2069 = vst.msk [vmem:[#allocation10 + $0x10] sm:$0xf] %vm2064_vm11, %v2056_v47  ;;  %v1550_v33 = vmax.f32 %v1548_v15, %v1549_v11  ;;  %v1400_v19 = vmax.f32 %v1276_v25, 0.0  ;;  %v1398_v26 = vmax.f32 %v1268_v2, 0.0  ;;  %v1731_v24 = vrot.slane %v1730_v58, 2 }
 0x22b   :  { %v1711_v60 = vmax.f32 %v1709_v5, %v1710_v54  ;;  %v1714_v42 = vsel %vm1426_vm2, %v1419_v20, -inf  ;;  %v1401_v38 = vmax.f32 %v1279_v16, 0.0  ;;  %v2227_v36 = vpack.c.bf16 %v1545_v61, %v1545_v61 }
 0x22c   :  { %v1551_v17 = vrot.slane %v1550_v33, 1  ;;  %v1715_v43 = vrot.slane %v1714_v42, 4  ;;  %v1581_v30 = vsel %vm1426_vm2, %v1400_v19, -inf  ;;  %v1732_v3 = vmax.f32 %v1730_v58, %v1731_v24 }
 0x22d   :  { %v1712_v7 = vrot.slane %v1711_v60, 1  ;;  %v1582_v27 = vrot.slane %v1581_v30, 4  ;;  %v1567_v45 = vsel %vm1426_vm2, %v1398_v26, -inf  ;;  %v2230_v40 = vpack.c.bf16 %v1566_v62, %v1566_v62 }
 0x22e   :  { %v1552_v14 = vmax.f32 %v1550_v33, %v1551_v17  ;;  %v1716_v4 = vmax.f32 %v1714_v42, %v1715_v43  ;;  %v1568_v28 = vrot.slane %v1567_v45, 4  ;;  %v1588_v1 = vsel %vm1426_vm2, %v1401_v38, -inf }
 0x22f   :  { %v1726_v57 = vrot.slane %v1725_v13, 1  ;;  %v1733_v46 = vrot.slane %v1732_v3, 1  ;;  %v1589_v22 = vrot.slane %v1588_v1, 4  ;;  %v1973_v48 = vunpack.c.l.b16 %v2229_v23 }
 0x230   :  { %v2228_v35 = vpack.c.bf16 %v1552_v14, %v1552_v14  ;;  %v1717_v31 = vrot.slane %v1716_v4, 2  ;;  %v1569_v49 = vmax.f32 %v1567_v45, %v1568_v28  ;;  %v1372_v8 = vadd.f32 %v2478_v51, %v3090_v9 }
 0x231   :  { %v1971_v39 = vunpack.c.l.b16 %v2227_v36  ;;  %v1713_v56 = vmax.f32 %v1711_v60, %v1712_v7  ;;  %v1583_v52 = vmax.f32 %v1581_v30, %v1582_v27  ;;  %v1590_v21 = vmax.f32 %v1588_v1, %v1589_v22 }
 0x232   :  { %v1972_v32 = vunpack.c.l.b16 %v2228_v35  ;;  %v1718_v34 = vmax.f32 %v1716_v4, %v1717_v31  ;;  %v1570_v50 = vrot.slane %v1569_v49, 2  ;;  %v1424_v55 = vmax.f32 %v1372_v8, 0.0 }
 0x233   :  { %v1974_v29 = vunpack.c.l.b16 %v2230_v40  ;;  %v1727_v59 = vmax.f32 %v1725_v13, %v1726_v57  ;;  %v1734_v61 = vmax.f32 %v1732_v3, %v1733_v46  ;;  %v2251_v9 = vpack.c.bf16 %v1713_v56, %v1713_v56 }
 0x234   :  { %v2024_v41 = vsel %vm2003_vm3, %v1972_v32, %v1971_v39  ;;  %v1719_v15 = vrot.slane %v1718_v34, 1  ;;  %v1571_v18 = vmax.f32 %v1569_v49, %v1570_v50  ;;  %v1749_v0 = vsel %vm1426_vm2, %v1424_v55, -inf }
 0x235   :  { %v2025_v62 = vsel %vm2005_vm4, %v1973_v48, %v2024_v41  ;;  %v1584_v5 = vrot.slane %v1583_v52, 2  ;;  %v1591_v53 = vrot.slane %v1590_v21, 2  ;;  %v1271_v12 = vadd.f32 %v2478_v51, %v3078_v44 }
 0x236   :  { %v2026_v10 = vsel %vm2007_vm5, %v1974_v29, %v2025_v62  ;;  %v1720_v47 = vmax.f32 %v1718_v34, %v1719_v15  ;;  %v1572_v11 = vrot.slane %v1571_v18, 1  ;;  %v2253_v23 = vpack.c.bf16 %v1727_v59, %v1727_v59 }
 0x237   :  { %v1750_v54 = vrot.slane %v1749_v0, 4  ;;  %v1364_v25 = vadd.f32 %v2478_v51, %v3093_v6  ;;  %v1375_v2 = vadd.f32 %v2478_v51, %v3095_v37  ;;  %v2254_v33 = vpack.c.bf16 %v1734_v61, %v1734_v61 }
 0x238   :  { %v2252_v58 = vpack.c.bf16 %v1720_v47, %v1720_v47  ;;  %v1573_v20 = vmax.f32 %v1571_v18, %v1572_v11  ;;  %v1399_v16 = vmax.f32 %v1271_v12, 0.0  ;;  %v1995_v13 = vunpack.c.l.b16 %v2251_v9 }
 0x239   :  { %v1585_v60 = vmax.f32 %v1583_v52, %v1584_v5  ;;  %v1422_v19 = vmax.f32 %v1364_v25, 0.0  ;;  %v1425_v26 = vmax.f32 %v1375_v2, 0.0  ;;  %v1592_v42 = vmax.f32 %v1590_v21, %v1591_v53 }
 0x23a   :  { %v1996_v17 = vunpack.c.l.b16 %v2252_v58  ;;  %v2231_v24 = vpack.c.bf16 %v1573_v20, %v1573_v20  ;;  %v1574_v38 = vsel %vm1426_vm2, %v1399_v16, -inf  ;;  %v1997_v44 = vunpack.c.l.b16 %v2253_v23 }
 0x23b   :  { %v1751_v36 = vmax.f32 %v1749_v0, %v1750_v54  ;;  %v1575_v7 = vrot.slane %v1574_v38, 4  ;;  %v1735_v6 = vsel %vm1426_vm2, %v1422_v19, -inf  ;;  %v1998_v43 = vunpack.c.l.b16 %v2254_v33 }
 0x23c   :  { %v2045_v37 = vsel %vm2003_vm3, %v1996_v17, %v1995_v13  ;;  %v1975_v30 = vunpack.c.l.b16 %v2231_v24  ;;  %v1736_v14 = vrot.slane %v1735_v6, 4  ;;  %v1586_v27 = vrot.slane %v1585_v60, 1 }
 0x23d   :  { %v2046_v3 = vsel %vm2005_vm4, %v1997_v44, %v2045_v37  ;;  %v1576_v45 = vmax.f32 %v1574_v38, %v1575_v7  ;;  %v1756_v40 = vsel %vm1426_vm2, %v1425_v26, -inf  ;;  %v1593_v28 = vrot.slane %v1592_v42, 1 }
 0x23e   :  { %v2027_v4 = vsel %vm2009_vm6, %v1975_v30, %v2026_v10  ;;  %v1737_v1 = vmax.f32 %v1735_v6, %v1736_v14  ;;  %v2047_v57 = vsel %vm2007_vm5, %v1998_v43, %v2046_v3  ;;  %v1752_v35 = vrot.slane %v1751_v36, 2 }
 0x23f   :  { %v1577_v46 = vrot.slane %v1576_v45, 2  ;;  %v1757_v22 = vrot.slane %v1756_v40, 4  ;;  %v1367_v48 = vadd.f32 %v2478_v51, %v3099_v63  ;;  %v1587_v32 = vmax.f32 %v1585_v60, %v1586_v27 }
 0x240   :  { %v1738_v31 = vrot.slane %v1737_v1, 2  ;;  %v1594_v56 = vmax.f32 %v1592_v42, %v1593_v28  ;;  %v1753_v34 = vmax.f32 %v1751_v36, %v1752_v35 }
 0x241   :  { %v1578_v49 = vmax.f32 %v1576_v45, %v1577_v46  ;;  %v1758_v8 = vmax.f32 %v1756_v40, %v1757_v22  ;;  %v1423_v39 = vmax.f32 %v1367_v48, 0.0  ;;  %v2233_v62 = vpack.c.bf16 %v1587_v32, %v1587_v32 }
 0x242   :  { %v1739_v52 = vmax.f32 %v1737_v1, %v1738_v31  ;;  %v2234_v63 = vpack.c.bf16 %v1594_v56, %v1594_v56  ;;  %v1754_v51 = vrot.slane %v1753_v34, 1 }
 0x243   :  { %v1579_v50 = vrot.slane %v1578_v49, 1  ;;  %v1759_v21 = vrot.slane %v1758_v8, 2  ;;  %v1742_v55 = vsel %vm1426_vm2, %v1423_v39, -inf  ;;  %v1977_v11 = vunpack.c.l.b16 %v2233_v62 }
 0x244   :  { %v1740_v29 = vrot.slane %v1739_v52, 1  ;;  %v1743_v59 = vrot.slane %v1742_v55, 4  ;;  %v1978_v23 = vunpack.c.l.b16 %v2234_v63  ;;  %v1755_v54 = vmax.f32 %v1753_v34, %v1754_v51 }
 0x245   :  { %v1580_v41 = vmax.f32 %v1578_v49, %v1579_v50  ;;  %v1760_v61 = vmax.f32 %v1758_v8, %v1759_v21 }
 0x246   :  { %v1741_v15 = vmax.f32 %v1739_v52, %v1740_v29  ;;  %v1744_v18 = vmax.f32 %v1742_v55, %v1743_v59  ;;  %v2257_v19 = vpack.c.bf16 %v1755_v54, %v1755_v54 }
 0x247   :  { %v2232_v0 = vpack.c.bf16 %v1580_v41, %v1580_v41  ;;  %v1761_v5 = vrot.slane %v1760_v61, 1 }
 0x248   :  { %v2255_v9 = vpack.c.bf16 %v1741_v15, %v1741_v15  ;;  %v1745_v10 = vrot.slane %v1744_v18, 2  ;;  %v2001_v42 = vunpack.c.l.b16 %v2257_v19 }
 0x249   :  { %v1976_v47 = vunpack.c.l.b16 %v2232_v0  ;;  %v1762_v58 = vmax.f32 %v1760_v61, %v1761_v5 }
 0x24a   :  { %v1999_v53 = vunpack.c.l.b16 %v2255_v9  ;;  %v1746_v12 = vmax.f32 %v1744_v18, %v1745_v10 }
 0x24b   :  { %v2028_v25 = vsel %vm2011_vm7, %v1976_v47, %v2027_v4  ;;  %v2258_v26 = vpack.c.bf16 %v1762_v58, %v1762_v58 }
 0x24c   :  { %v2029_v2 = vsel %vm2013_vm9, %v1977_v11, %v2028_v25  ;;  %v2048_v33 = vsel %vm2009_vm6, %v1999_v53, %v2047_v57  ;;  %v1747_v20 = vrot.slane %v1746_v12, 1 }
 0x24d   :  { %v2030_v16 = vsel %vm2015_vm10, %v1978_v23, %v2029_v2  ;;  %v2002_v38 = vunpack.c.l.b16 %v2258_v26 }
 0x24e   :  { %v2054_v13 = vpack.c.b16 %v2030_v16, %v2030_v16  ;;  %v1748_v60 = vmax.f32 %v1746_v12, %v1747_v20 }
 0x250   :  { %2067 = vst.msk [vmem:[#allocation10 + $0x8] sm:$0xf] %vm2064_vm11, %v2054_v13  ;;  %v2256_v17 = vpack.c.bf16 %v1748_v60, %v1748_v60 }
 0x252   :  { %v2000_v24 = vunpack.c.l.b16 %v2256_v17 }
 0x254   :  { %v2049_v44 = vsel %vm2011_vm7, %v2000_v24, %v2048_v33 }
 0x255   :  { %v2050_v36 = vsel %vm2013_vm9, %v2001_v42, %v2049_v44 }
 0x256   :  { %v2051_v7 = vsel %vm2015_vm10, %v2002_v38, %v2050_v36 }
 0x257   :  { %v2057_v6 = vpack.c.b16 %v2051_v7, %v2051_v7 }
 0x259   :  { %2070 = vst.msk [vmem:[#allocation10 + $0x14] sm:$0xf] %vm2064_vm11, %v2057_v6 }
 0x25a   :  { %2578 = shalt.err (!%p2575_p8)
}
 0x25b   :  { %s2579_s14 = scalar_lea.hbm %s3225_s4, 384 }
 0x25c   :  { %p2580_p9 = scmp.ne.s32.totalorder %s3225_s4, %s2579_s14  ;;  %p2583_p10 = scmp.lt.u32.totalorder %s2579_s14, %s3225_s4 }
 0x25e   :  { %p2585_p11 = pnand %p2583_p10, %p2580_p9 }
 0x260   :  { %2588 = shalt.err (!%p2585_p11)
}
 0x261   :  { %s2607_s20 = smov 64   ;;  %s2608_s21 = smov 4  }
 0x262   :  { %2082 = dma.vmem_to_hbm [thread:$0]  %s2077_s11, 384, %s3225_s4, [#allocation4], %s2607_s20, %s2607_s20, %s2608_s21  }
 0x263   :  { %2595 = dma.done.wait [#allocation4], 384  }
 0x264   :  { %2596 = vsyncadd [#allocation4], 4294966912 }
 0x265   :  { %2086 = vsyncpa [#allocation3], 1 }
 0x266   :  { %2087 = vsyncpa [#allocation6], 1 }
 0x267   :  { %2088 = vsyncpa [#allocation9], 1 }
 0x268   :  { %2089 = vsyncpa [#allocation4], 1 }

</bundles_post_ra>
